<compile_context>
chip_gen: v6e
topology: v6e:2x2x1
jax: 0.10.0
libtpu: 0.0.40
codegen_flags: <defaults>
</compile_context>

<pallas_src>
import functools
import math

import jax
import jax.numpy as jnp
from jax import lax
from jax.experimental import pallas as pl
from jax.experimental.pallas import tpu as pltpu


def pool_kernel(cls_ref, planes_ref, weff_ref, beff_ref, wff_ref, bff_ref,
                cls_out_ref, sp_out_ref, *, bt, ho, wo, c, d2):
    f32 = jnp.float32
    hw = ho * wo
    m = bt * hw

    # ---- cls-token linear, batched over the batch tile: (bt,C) @ (C,2C) + b ----
    cls_in = cls_ref[:, 0, :].astype(f32)                            # (bt, C)
    cls_out = jnp.dot(cls_in, wff_ref[...].astype(f32),
                      preferred_element_type=f32) + bff_ref[...]
    cls_out_ref[...] = cls_out[:, None, :].astype(cls_out_ref.dtype)

    # ---- fused depthwise(3x3, s2) + pointwise(1x1): 9 accumulating matmuls ----
    # Tap (ky,kx) reads plane j = (ky%2)*3 + kx at row offset (ky//2)*wo: a
    # sublane-contiguous (bt, hw, C) slice with channels staying on lanes, so
    # the (bt,hw,C)->(m,C) reshape is tile-aligned (hw is a multiple of 8 here).
    acc = None
    for ky in range(3):
        dy = ky // 2
        for kx in range(3):
            t = ky * 3 + kx
            j = (ky % 2) * 3 + kx
            patch = planes_ref[:, j, pl.ds(dy * wo, hw), :]          # (bt, hw, C)
            patch = patch.reshape(m, c).astype(f32)
            contrib = jnp.dot(patch, weff_ref[t].astype(f32),
                              preferred_element_type=f32)            # (m, 2C), MXU
            acc = contrib if acc is None else acc + contrib
    y = acc + beff_ref[...]                                          # dw+pw bias folded
    sp_out_ref[...] = y.reshape(bt, hw, d2).astype(sp_out_ref.dtype)


def pool_forward(x, dw_w, dw_b, pw_w, pw_b, ff_w, ff_b, *, block_b=8):
    """x: (B, 1 + h*w, C) float32.  Returns (B, 1 + h'*w', 2C).

    block_b tuning: 8 gives 128-row matmuls (native for v5e's 128x128 MXU);
    on v6e/v7x prefer block_b >= 16 so M = block_b*hw >= 256 fills the 256-wide
    MXU, while keeping >= 2 grid steps per v7x TensorCore and the
    double-buffered per-step blocks well inside the scoped-VMEM default
    (v5e 16 MiB, v6e/v7x 32 MiB; v7x physical VMEM is only 64 MiB).
    """
    B, N, C = x.shape
    D2 = 2 * C
    h = math.isqrt(N - 1)
    w = h
    ho = (h + 1) // 2
    wo = (w + 1) // 2
    hw = ho * wo

    # ---------- wrapper glue (plain JAX): pad + parity/space-to-depth split ----------
    # TODO(synk): this pad/slice/stack still materializes ~2x the token bytes in HBM
    # before the kernel; fuse into the producer (or move padding in-kernel) if xprof
    # shows it dominating.
    cls_tok = x[:, :1, :]                                            # (B, 1, C)
    tok = x[:, 1:, :].reshape(B, h, w, C)                            # NHWC
    xpad = jnp.pad(tok, ((0, 0),
                         (1, 1 + 2 * ho - h),
                         (1, 1 + 2 * wo - w),
                         (0, 0)))                                    # (B, 2ho+2, 2wo+2, C)
    planes = []
    for pr in range(2):              # row parity  (= ky % 2)
        for kx in range(3):          # kernel column tap
            pc, dx = kx % 2, kx // 2
            p = xpad[:, pr::2, pc::2, :][:, :, dx:dx + wo, :]        # (B, ho+1, wo, C)
            planes.append(p.reshape(B, (ho + 1) * wo, C))
    planes6 = jnp.stack(planes, axis=1)                              # (B, 6, (ho+1)*wo, C)

    # ---------- weight prep: fold pointwise conv into per-tap depthwise weights ----------
    dw = dw_w[:, 0]                                                  # (2C, 3, 3)
    dw_e = dw[0::2].reshape(C, 9)                                    # even out-channel taps
    dw_o = dw[1::2].reshape(C, 9)                                    # odd  out-channel taps
    pw = pw_w[:, :, 0, 0]                                            # (2C_out, 2C_in)
    pw_e = pw[:, 0::2].T                                             # (C, 2C)
    pw_o = pw[:, 1::2].T                                             # (C, 2C)
    w_eff = (dw_e.T[:, :, None] * pw_e[None]
             + dw_o.T[:, :, None] * pw_o[None])                      # (9, C, 2C)
    b_eff = (pw @ dw_b + pw_b).reshape(1, D2)                        # dw bias folded into pw bias
    w_ff_t = ff_w.T                                                  # (C, 2C)
    b_ff2 = ff_b.reshape(1, D2)

    # ---------- batch tiling ----------
    bt = max(1, min(block_b, B))
    Bp = ((B + bt - 1) // bt) * bt
    if Bp != B:
        padb = Bp - B
        cls_tok = jnp.pad(cls_tok, ((0, padb), (0, 0), (0, 0)))
        planes6 = jnp.pad(planes6, ((0, padb), (0, 0), (0, 0), (0, 0)))

    kernel = functools.partial(pool_kernel, bt=bt, ho=ho, wo=wo, c=C, d2=D2)
    cls_out, sp_out = pl.pallas_call(
        kernel,
        out_shape=(jax.ShapeDtypeStruct((Bp, 1, D2), x.dtype),
                   jax.ShapeDtypeStruct((Bp, hw, D2), x.dtype)),
        grid=(Bp // bt,),
        in_specs=[
            pl.BlockSpec((bt, 1, C), lambda b: (b, 0, 0)),                    # cls tokens
            pl.BlockSpec((bt, 6, (ho + 1) * wo, C), lambda b: (b, 0, 0, 0)),  # stacked planes
            pl.BlockSpec((9, C, D2), lambda b: (0, 0, 0)),                    # fused tap weights
            pl.BlockSpec((1, D2), lambda b: (0, 0)),                          # effective bias
            pl.BlockSpec((C, D2), lambda b: (0, 0)),                          # cls ff weight
            pl.BlockSpec((1, D2), lambda b: (0, 0)),                          # cls ff bias
        ],
        out_specs=[
            pl.BlockSpec((bt, 1, D2), lambda b: (b, 0, 0)),                   # cls out
            pl.BlockSpec((bt, hw, D2), lambda b: (b, 0, 0)),                  # spatial out
        ],
        compiler_params=pltpu.CompilerParams(
            dimension_semantics=("parallel",)),                      # shards over v7x cores
    )(cls_tok, planes6, w_eff, b_eff, w_ff_t, b_ff2)

    out = jnp.concatenate([cls_out, sp_out], axis=1)                 # module returns one tensor
    return out[:B]


def pool_reference(x, dw_w, dw_b, pw_w, pw_b, ff_w, ff_b):
    """Pure-JAX reference mirroring the PyTorch module (NCHW convs)."""
    B, N, C = x.shape
    h = math.isqrt(N - 1)
    cls_tok, tok = x[:, :1], x[:, 1:]
    cls_out = jnp.matmul(cls_tok, ff_w.T, precision=lax.Precision.HIGHEST) + ff_b
    timg = tok.reshape(B, h, h, C).transpose(0, 3, 1, 2)             # NCHW
    y = lax.conv_general_dilated(timg, dw_w, (2, 2), ((1, 1), (1, 1)),
                                 feature_group_count=C,
                                 dimension_numbers=('NCHW', 'OIHW', 'NCHW'),
                                 precision=lax.Precision.HIGHEST)
    y = y + dw_b[None, :, None, None]
    y = lax.conv_general_dilated(y, pw_w, (1, 1), ((0, 0), (0, 0)),
                                 dimension_numbers=('NCHW', 'OIHW', 'NCHW'),
                                 precision=lax.Precision.HIGHEST)
    y = y + pw_b[None, :, None, None]
    y = y.transpose(0, 2, 3, 1).reshape(B, -1, 2 * C)
    return jnp.concatenate([cls_out, y], axis=1)


if __name__ == "__main__":
    # PiT-style stage: dim=64 -> 2C=128 lane-dense stores / fused (C,2C) tap weights.
    # B=32 with batch tile 8 -> grid of 4 parallel steps (>=2 per v7x TensorCore),
    # matmul M = 8*16 = 128 rows per step.
    B, dim, h = 32, 64, 8            # x: (B, 1 + h*h, dim)
    key = jax.random.PRNGKey(0)
    ks = jax.random.split(key, 7)

    x = jax.random.normal(ks[0], (B, 1 + h * h, dim), jnp.float32)
    dw_w = jax.random.normal(ks[1], (2 * dim, 1, 3, 3), jnp.float32) * 0.1
    dw_b = jax.random.normal(ks[2], (2 * dim,), jnp.float32) * 0.1
    pw_w = jax.random.normal(ks[3], (2 * dim, 2 * dim, 1, 1), jnp.float32) * 0.1
    pw_b = jax.random.normal(ks[4], (2 * dim,), jnp.float32) * 0.1
    ff_w = jax.random.normal(ks[5], (2 * dim, dim), jnp.float32) * 0.1
    ff_b = jax.random.normal(ks[6], (2 * dim,), jnp.float32) * 0.1

    out = jax.block_until_ready(
        pool_forward(x, dw_w, dw_b, pw_w, pw_b, ff_w, ff_b, block_b=8))
    ref = pool_reference(x, dw_w, dw_b, pw_w, pw_b, ff_w, ff_b)
    assert out.shape == ref.shape == (B, 1 + (h // 2) ** 2, 2 * dim)
    err = float(jnp.max(jnp.abs(out - ref)))
    assert jnp.allclose(out, ref, atol=3e-4, rtol=3e-4), err
    print("KERNEL_OK")
</pallas_src>

<mosaic_0001>
module attributes {stable_mosaic.version = 11 : i64} {
  func.func @pool_kernel(%arg0: i32, %arg1: memref<8x1x64xf32, #tpu.memory_space<vmem>>, %arg2: memref<8x6x20x64xf32, #tpu.memory_space<vmem>>, %arg3: memref<9x64x128xf32, #tpu.memory_space<vmem>>, %arg4: memref<1x128xf32, #tpu.memory_space<vmem>>, %arg5: memref<64x128xf32, #tpu.memory_space<vmem>>, %arg6: memref<1x128xf32, #tpu.memory_space<vmem>>, %arg7: memref<8x1x128xf32, #tpu.memory_space<vmem>>, %arg8: memref<8x16x128xf32, #tpu.memory_space<vmem>>) attributes {dimension_semantics = [#tpu.dimension_semantics<parallel>], iteration_bounds = array<i64: 4>, scalar_prefetch = 0 : i64, scratch_operands = 0 : i64, tpu.core_type = #tpu.core_type<tc>, window_params = [{transform_indices = @transform_0, window_bounds = array<i64: 8, 1, 64>}, {transform_indices = @transform_1, window_bounds = array<i64: 8, 6, 20, 64>}, {pipeline_mode = #tpu.pipeline_mode<synchronous>, transform_indices = @transform_2, window_bounds = array<i64: 9, 64, 128>}, {pipeline_mode = #tpu.pipeline_mode<synchronous>, transform_indices = @transform_3, window_bounds = array<i64: 1, 128>}, {pipeline_mode = #tpu.pipeline_mode<synchronous>, transform_indices = @transform_4, window_bounds = array<i64: 64, 128>}, {pipeline_mode = #tpu.pipeline_mode<synchronous>, transform_indices = @transform_5, window_bounds = array<i64: 1, 128>}, {transform_indices = @transform_6, window_bounds = array<i64: 8, 1, 128>}, {transform_indices = @transform_7, window_bounds = array<i64: 8, 16, 128>}]} {
    %c0 = arith.constant 0 : index
    %c0_0 = arith.constant 0 : index
    %c0_1 = arith.constant 0 : index
    %0 = vector.load %arg1[%c0, %c0_0, %c0_1] : memref<8x1x64xf32, #tpu.memory_space<vmem>>, vector<8x1x64xf32>
    %1 = vector.shape_cast %0 : vector<8x1x64xf32> to vector<8x64xf32>
    %c0_2 = arith.constant 0 : index
    %c0_3 = arith.constant 0 : index
    %2 = vector.load %arg5[%c0_2, %c0_3] : memref<64x128xf32, #tpu.memory_space<vmem>>, vector<64x128xf32>
    %cst = arith.constant dense<0.000000e+00> : vector<8x128xf32>
    %3 = tpu.matmul %1, %2, %cst {dimension_numbers = #tpu.dot_dimension_numbers<[1], [0], [0], [1], [0, 0, 1, 1], [], []>} : vector<8x64xf32>, vector<64x128xf32>, vector<8x128xf32> -> vector<8x128xf32>
    %c0_4 = arith.constant 0 : index
    %c0_5 = arith.constant 0 : index
    %4 = vector.load %arg6[%c0_4, %c0_5] : memref<1x128xf32, #tpu.memory_space<vmem>>, vector<1x128xf32>
    %5 = vector.broadcast %4 : vector<1x128xf32> to vector<8x128xf32>
    %6 = arith.addf %3, %5 : vector<8x128xf32>
    %7 = vector.shape_cast %6 : vector<8x128xf32> to vector<8x1x128xf32>
    %c0_6 = arith.constant 0 : index
    %c0_7 = arith.constant 0 : index
    %c0_8 = arith.constant 0 : index
    %8 = vector.load %arg7[%c0_6, %c0_7, %c0_8] : memref<8x1x128xf32, #tpu.memory_space<vmem>>, vector<8x1x128xf32>
    tpu.vector_store %arg7[%c0_6, %c0_7, %c0_8], %7 {strides = array<i32>} : memref<8x1x128xf32, #tpu.memory_space<vmem>>, vector<8x1x128xf32>,
    %c0_9 = arith.constant 0 : index
    %c0_10 = arith.constant 0 : index
    %c0_11 = arith.constant 0 : index
    %c0_12 = arith.constant 0 : index
    %9 = vector.load %arg2[%c0_9, %c0_10, %c0_11, %c0_12] : memref<8x6x20x64xf32, #tpu.memory_space<vmem>>, vector<8x1x16x64xf32>
    %10 = vector.shape_cast %9 : vector<8x1x16x64xf32> to vector<8x16x64xf32>
    %11 = vector.shape_cast %10 : vector<8x16x64xf32> to vector<128x64xf32>
    %c0_13 = arith.constant 0 : index
    %c0_14 = arith.constant 0 : index
    %c0_15 = arith.constant 0 : index
    %12 = vector.load %arg3[%c0_13, %c0_14, %c0_15] : memref<9x64x128xf32, #tpu.memory_space<vmem>>, vector<1x64x128xf32>
    %13 = vector.shape_cast %12 : vector<1x64x128xf32> to vector<64x128xf32>
    %cst_16 = arith.constant dense<0.000000e+00> : vector<128x128xf32>
    %14 = tpu.matmul %11, %13, %cst_16 {dimension_numbers = #tpu.dot_dimension_numbers<[1], [0], [0], [1], [0, 0, 1, 1], [], []>} : vector<128x64xf32>, vector<64x128xf32>, vector<128x128xf32> -> vector<128x128xf32>
    %c0_17 = arith.constant 0 : index
    %c1 = arith.constant 1 : index
    %c0_18 = arith.constant 0 : index
    %c0_19 = arith.constant 0 : index
    %15 = vector.load %arg2[%c0_17, %c1, %c0_18, %c0_19] : memref<8x6x20x64xf32, #tpu.memory_space<vmem>>, vector<8x1x16x64xf32>
    %16 = vector.shape_cast %15 : vector<8x1x16x64xf32> to vector<8x16x64xf32>
    %17 = vector.shape_cast %16 : vector<8x16x64xf32> to vector<128x64xf32>
    %c1_20 = arith.constant 1 : index
    %c0_21 = arith.constant 0 : index
    %c0_22 = arith.constant 0 : index
    %18 = vector.load %arg3[%c1_20, %c0_21, %c0_22] : memref<9x64x128xf32, #tpu.memory_space<vmem>>, vector<1x64x128xf32>
    %19 = vector.shape_cast %18 : vector<1x64x128xf32> to vector<64x128xf32>
    %cst_23 = arith.constant dense<0.000000e+00> : vector<128x128xf32>
    %20 = tpu.matmul %17, %19, %cst_23 {dimension_numbers = #tpu.dot_dimension_numbers<[1], [0], [0], [1], [0, 0, 1, 1], [], []>} : vector<128x64xf32>, vector<64x128xf32>, vector<128x128xf32> -> vector<128x128xf32>
    %21 = arith.addf %14, %20 : vector<128x128xf32>
    %c0_24 = arith.constant 0 : index
    %c2 = arith.constant 2 : index
    %c0_25 = arith.constant 0 : index
    %c0_26 = arith.constant 0 : index
    %22 = vector.load %arg2[%c0_24, %c2, %c0_25, %c0_26] : memref<8x6x20x64xf32, #tpu.memory_space<vmem>>, vector<8x1x16x64xf32>
    %23 = vector.shape_cast %22 : vector<8x1x16x64xf32> to vector<8x16x64xf32>
    %24 = vector.shape_cast %23 : vector<8x16x64xf32> to vector<128x64xf32>
    %c2_27 = arith.constant 2 : index
    %c0_28 = arith.constant 0 : index
    %c0_29 = arith.constant 0 : index
    %25 = vector.load %arg3[%c2_27, %c0_28, %c0_29] : memref<9x64x128xf32, #tpu.memory_space<vmem>>, vector<1x64x128xf32>
    %26 = vector.shape_cast %25 : vector<1x64x128xf32> to vector<64x128xf32>
    %cst_30 = arith.constant dense<0.000000e+00> : vector<128x128xf32>
    %27 = tpu.matmul %24, %26, %cst_30 {dimension_numbers = #tpu.dot_dimension_numbers<[1], [0], [0], [1], [0, 0, 1, 1], [], []>} : vector<128x64xf32>, vector<64x128xf32>, vector<128x128xf32> -> vector<128x128xf32>
    %28 = arith.addf %21, %27 : vector<128x128xf32>
    %c0_31 = arith.constant 0 : index
    %c3 = arith.constant 3 : index
    %c0_32 = arith.constant 0 : index
    %c0_33 = arith.constant 0 : index
    %29 = vector.load %arg2[%c0_31, %c3, %c0_32, %c0_33] : memref<8x6x20x64xf32, #tpu.memory_space<vmem>>, vector<8x1x16x64xf32>
    %30 = vector.shape_cast %29 : vector<8x1x16x64xf32> to vector<8x16x64xf32>
    %31 = vector.shape_cast %30 : vector<8x16x64xf32> to vector<128x64xf32>
    %c3_34 = arith.constant 3 : index
    %c0_35 = arith.constant 0 : index
    %c0_36 = arith.constant 0 : index
    %32 = vector.load %arg3[%c3_34, %c0_35, %c0_36] : memref<9x64x128xf32, #tpu.memory_space<vmem>>, vector<1x64x128xf32>
    %33 = vector.shape_cast %32 : vector<1x64x128xf32> to vector<64x128xf32>
    %cst_37 = arith.constant dense<0.000000e+00> : vector<128x128xf32>
    %34 = tpu.matmul %31, %33, %cst_37 {dimension_numbers = #tpu.dot_dimension_numbers<[1], [0], [0], [1], [0, 0, 1, 1], [], []>} : vector<128x64xf32>, vector<64x128xf32>, vector<128x128xf32> -> vector<128x128xf32>
    %35 = arith.addf %28, %34 : vector<128x128xf32>
    %c0_38 = arith.constant 0 : index
    %c4 = arith.constant 4 : index
    %c0_39 = arith.constant 0 : index
    %c0_40 = arith.constant 0 : index
    %36 = vector.load %arg2[%c0_38, %c4, %c0_39, %c0_40] : memref<8x6x20x64xf32, #tpu.memory_space<vmem>>, vector<8x1x16x64xf32>
    %37 = vector.shape_cast %36 : vector<8x1x16x64xf32> to vector<8x16x64xf32>
    %38 = vector.shape_cast %37 : vector<8x16x64xf32> to vector<128x64xf32>
    %c4_41 = arith.constant 4 : index
    %c0_42 = arith.constant 0 : index
    %c0_43 = arith.constant 0 : index
    %39 = vector.load %arg3[%c4_41, %c0_42, %c0_43] : memref<9x64x128xf32, #tpu.memory_space<vmem>>, vector<1x64x128xf32>
    %40 = vector.shape_cast %39 : vector<1x64x128xf32> to vector<64x128xf32>
    %cst_44 = arith.constant dense<0.000000e+00> : vector<128x128xf32>
    %41 = tpu.matmul %38, %40, %cst_44 {dimension_numbers = #tpu.dot_dimension_numbers<[1], [0], [0], [1], [0, 0, 1, 1], [], []>} : vector<128x64xf32>, vector<64x128xf32>, vector<128x128xf32> -> vector<128x128xf32>
    %42 = arith.addf %35, %41 : vector<128x128xf32>
    %c0_45 = arith.constant 0 : index
    %c5 = arith.constant 5 : index
    %c0_46 = arith.constant 0 : index
    %c0_47 = arith.constant 0 : index
    %43 = vector.load %arg2[%c0_45, %c5, %c0_46, %c0_47] : memref<8x6x20x64xf32, #tpu.memory_space<vmem>>, vector<8x1x16x64xf32>
    %44 = vector.shape_cast %43 : vector<8x1x16x64xf32> to vector<8x16x64xf32>
    %45 = vector.shape_cast %44 : vector<8x16x64xf32> to vector<128x64xf32>
    %c5_48 = arith.constant 5 : index
    %c0_49 = arith.constant 0 : index
    %c0_50 = arith.constant 0 : index
    %46 = vector.load %arg3[%c5_48, %c0_49, %c0_50] : memref<9x64x128xf32, #tpu.memory_space<vmem>>, vector<1x64x128xf32>
    %47 = vector.shape_cast %46 : vector<1x64x128xf32> to vector<64x128xf32>
    %cst_51 = arith.constant dense<0.000000e+00> : vector<128x128xf32>
    %48 = tpu.matmul %45, %47, %cst_51 {dimension_numbers = #tpu.dot_dimension_numbers<[1], [0], [0], [1], [0, 0, 1, 1], [], []>} : vector<128x64xf32>, vector<64x128xf32>, vector<128x128xf32> -> vector<128x128xf32>
    %49 = arith.addf %42, %48 : vector<128x128xf32>
    %c0_52 = arith.constant 0 : index
    %c0_53 = arith.constant 0 : index
    %c4_54 = arith.constant 4 : index
    %c0_55 = arith.constant 0 : index
    %50 = vector.load %arg2[%c0_52, %c0_53, %c4_54, %c0_55] : memref<8x6x20x64xf32, #tpu.memory_space<vmem>>, vector<8x1x16x64xf32>
    %51 = vector.shape_cast %50 : vector<8x1x16x64xf32> to vector<8x16x64xf32>
    %52 = vector.shape_cast %51 : vector<8x16x64xf32> to vector<128x64xf32>
    %c6 = arith.constant 6 : index
    %c0_56 = arith.constant 0 : index
    %c0_57 = arith.constant 0 : index
    %53 = vector.load %arg3[%c6, %c0_56, %c0_57] : memref<9x64x128xf32, #tpu.memory_space<vmem>>, vector<1x64x128xf32>
    %54 = vector.shape_cast %53 : vector<1x64x128xf32> to vector<64x128xf32>
    %cst_58 = arith.constant dense<0.000000e+00> : vector<128x128xf32>
    %55 = tpu.matmul %52, %54, %cst_58 {dimension_numbers = #tpu.dot_dimension_numbers<[1], [0], [0], [1], [0, 0, 1, 1], [], []>} : vector<128x64xf32>, vector<64x128xf32>, vector<128x128xf32> -> vector<128x128xf32>
    %56 = arith.addf %49, %55 : vector<128x128xf32>
    %c0_59 = arith.constant 0 : index
    %c1_60 = arith.constant 1 : index
    %c4_61 = arith.constant 4 : index
    %c0_62 = arith.constant 0 : index
    %57 = vector.load %arg2[%c0_59, %c1_60, %c4_61, %c0_62] : memref<8x6x20x64xf32, #tpu.memory_space<vmem>>, vector<8x1x16x64xf32>
    %58 = vector.shape_cast %57 : vector<8x1x16x64xf32> to vector<8x16x64xf32>
    %59 = vector.shape_cast %58 : vector<8x16x64xf32> to vector<128x64xf32>
    %c7 = arith.constant 7 : index
    %c0_63 = arith.constant 0 : index
    %c0_64 = arith.constant 0 : index
    %60 = vector.load %arg3[%c7, %c0_63, %c0_64] : memref<9x64x128xf32, #tpu.memory_space<vmem>>, vector<1x64x128xf32>
    %61 = vector.shape_cast %60 : vector<1x64x128xf32> to vector<64x128xf32>
    %cst_65 = arith.constant dense<0.000000e+00> : vector<128x128xf32>
    %62 = tpu.matmul %59, %61, %cst_65 {dimension_numbers = #tpu.dot_dimension_numbers<[1], [0], [0], [1], [0, 0, 1, 1], [], []>} : vector<128x64xf32>, vector<64x128xf32>, vector<128x128xf32> -> vector<128x128xf32>
    %63 = arith.addf %56, %62 : vector<128x128xf32>
    %c0_66 = arith.constant 0 : index
    %c2_67 = arith.constant 2 : index
    %c4_68 = arith.constant 4 : index
    %c0_69 = arith.constant 0 : index
    %64 = vector.load %arg2[%c0_66, %c2_67, %c4_68, %c0_69] : memref<8x6x20x64xf32, #tpu.memory_space<vmem>>, vector<8x1x16x64xf32>
    %65 = vector.shape_cast %64 : vector<8x1x16x64xf32> to vector<8x16x64xf32>
    %66 = vector.shape_cast %65 : vector<8x16x64xf32> to vector<128x64xf32>
    %c8 = arith.constant 8 : index
    %c0_70 = arith.constant 0 : index
    %c0_71 = arith.constant 0 : index
    %67 = vector.load %arg3[%c8, %c0_70, %c0_71] : memref<9x64x128xf32, #tpu.memory_space<vmem>>, vector<1x64x128xf32>
    %68 = vector.shape_cast %67 : vector<1x64x128xf32> to vector<64x128xf32>
    %cst_72 = arith.constant dense<0.000000e+00> : vector<128x128xf32>
    %69 = tpu.matmul %66, %68, %cst_72 {dimension_numbers = #tpu.dot_dimension_numbers<[1], [0], [0], [1], [0, 0, 1, 1], [], []>} : vector<128x64xf32>, vector<64x128xf32>, vector<128x128xf32> -> vector<128x128xf32>
    %70 = arith.addf %63, %69 : vector<128x128xf32>
    %c0_73 = arith.constant 0 : index
    %c0_74 = arith.constant 0 : index
    %71 = vector.load %arg4[%c0_73, %c0_74] : memref<1x128xf32, #tpu.memory_space<vmem>>, vector<1x128xf32>
    %72 = vector.broadcast %71 : vector<1x128xf32> to vector<128x128xf32>
    %73 = arith.addf %70, %72 : vector<128x128xf32>
    %74 = vector.shape_cast %73 : vector<128x128xf32> to vector<8x16x128xf32>
    %c0_75 = arith.constant 0 : index
    %c0_76 = arith.constant 0 : index
    %c0_77 = arith.constant 0 : index
    %75 = vector.load %arg8[%c0_75, %c0_76, %c0_77] : memref<8x16x128xf32, #tpu.memory_space<vmem>>, vector<8x16x128xf32>
    tpu.vector_store %arg8[%c0_75, %c0_76, %c0_77], %74 {strides = array<i32>} : memref<8x16x128xf32, #tpu.memory_space<vmem>>, vector<8x16x128xf32>,
    return
  }
  func.func @transform_0(%arg0: i32) -> (i32, i32, i32) {
    %c0_i32 = arith.constant 0 : i32
    %c0_i32_0 = arith.constant 0 : i32
    %c0_i32_1 = arith.constant 0 : i32
    return %arg0, %c0_i32, %c0_i32_0 : i32, i32, i32
  }
  func.func @transform_1(%arg0: i32) -> (i32, i32, i32, i32) {
    %c0_i32 = arith.constant 0 : i32
    %c0_i32_0 = arith.constant 0 : i32
    %c0_i32_1 = arith.constant 0 : i32
    %c0_i32_2 = arith.constant 0 : i32
    return %arg0, %c0_i32, %c0_i32_0, %c0_i32_1 : i32, i32, i32, i32
  }
  func.func @transform_2(%arg0: i32) -> (i32, i32, i32) {
    %c0_i32 = arith.constant 0 : i32
    %c0_i32_0 = arith.constant 0 : i32
    %c0_i32_1 = arith.constant 0 : i32
    %c0_i32_2 = arith.constant 0 : i32
    return %c0_i32, %c0_i32_0, %c0_i32_1 : i32, i32, i32
  }
  func.func @transform_3(%arg0: i32) -> (i32, i32) {
    %c0_i32 = arith.constant 0 : i32
    %c0_i32_0 = arith.constant 0 : i32
    %c0_i32_1 = arith.constant 0 : i32
    return %c0_i32, %c0_i32_0 : i32, i32
  }
  func.func @transform_4(%arg0: i32) -> (i32, i32) {
    %c0_i32 = arith.constant 0 : i32
    %c0_i32_0 = arith.constant 0 : i32
    %c0_i32_1 = arith.constant 0 : i32
    return %c0_i32, %c0_i32_0 : i32, i32
  }
  func.func @transform_5(%arg0: i32) -> (i32, i32) {
    %c0_i32 = arith.constant 0 : i32
    %c0_i32_0 = arith.constant 0 : i32
    %c0_i32_1 = arith.constant 0 : i32
    return %c0_i32, %c0_i32_0 : i32, i32
  }
  func.func @transform_6(%arg0: i32) -> (i32, i32, i32) {
    %c0_i32 = arith.constant 0 : i32
    %c0_i32_0 = arith.constant 0 : i32
    %c0_i32_1 = arith.constant 0 : i32
    return %arg0, %c0_i32, %c0_i32_0 : i32, i32, i32
  }
  func.func @transform_7(%arg0: i32) -> (i32, i32, i32) {
    %c0_i32 = arith.constant 0 : i32
    %c0_i32_0 = arith.constant 0 : i32
    %c0_i32_1 = arith.constant 0 : i32
    return %arg0, %c0_i32, %c0_i32_0 : i32, i32, i32
  }
}

</mosaic_0001>

<bundles_post_ra>
// kernel: tpu_custom_call.1
= control target key start
LH: loop header
LB: loop body
LE: loop exit
PB: predicated region body
PF: predicated region fallthrough
CT: control target
= control target key end

     0   :  { %13 = vsyncpa [#allocation3], 0  ;;  %s4909_s0 = inlined_call_operand.vmem [shape: f32[32,1,64], index: 0, kind: input, shape index: {}]   ;;  %s4910_s1 = inlined_call_operand.vmem [shape: f32[32,6,20,64], index: 1, kind: input, shape index: {}]   ;;  %s4911_s2 = inlined_call_operand.vmem [shape: f32[9,64,128], index: 2, kind: input, shape index: {}]   ;;  %s4912_s3 = inlined_call_operand.vmem [shape: f32[1,128], index: 3, kind: input, shape index: {}]   ;;  %s4913_s4 = inlined_call_operand.vmem [shape: f32[64,128], index: 4, kind: input, shape index: {}]   ;;  %s4914_s5 = inlined_call_operand.vmem [shape: f32[1,128], index: 5, kind: input, shape index: {}]   ;;  %s4915_s6 = inlined_call_operand.hbm [shape: f32[32,1,128], index: 6, kind: output, shape index: {0}]   ;;  %s4916_s7 = inlined_call_operand.hbm [shape: f32[32,16,128], index: 7, kind: output, shape index: {1}]  }
   0x1   :  { %15 = vsyncpa [#allocation3 + $0x1], 0 }
   0x2   :  { %16 = vsyncpa [#allocation5], 0 }
   0x3   :  { %18 = vsyncpa [#allocation5 + $0x1], 0  ;;  %s3950_s24 = smov 0   ;;  %s3952_s25 = smov 0  }
   0x4   :  { %s3954_s26 = smov 0   ;;  %s3956_s27 = smov 0  }
   0x5 LB: > { %s3971_s28 = sadd.s32 4294967295, %s3899_s27   ;;  %s2789_s29 = sadd.s32 4294967294, %s3899_s27   ;;  %s3899_s27 = sphi %s3956_s27, %s4966_s27   ;;  %s3895_s26 = sphi %s3954_s26, %s4965_s26   ;;  %s3891_s25 = sphi %s3952_s25, %s4964_s25   ;;  %s3887_s24 = sphi %s3950_s24, %s4963_s24  }
   0x6   : > { %s3975_s30 = sadd.s32 1, %s3899_s27   ;;  %s167_s8 = sadd.s32 1, %s3895_s26 }
   0x7   : > { %s164_s9 = ssub.s32 %s3899_s27, %s3975_s30  ;;  %p177_p0 = scmp.ne.s32.totalorder %s3895_s26, %s3891_s25 }
   0x8   : > { %p165_p1 = scmp.eq.s32.totalorder %s164_s9, 0  ;;  %p178_p2 = scmp.eq.s32.totalorder %s3971_s28, 3 }
   0x9   : > { %p183_p3 = scmp.ne.s32.totalorder %s3891_s25, %s3887_s24  ;;  %p184_p4 = scmp.eq.s32.totalorder %s2789_s29, 3 }
   0xa   : > { %s3986_s10 = scalar_select %p165_p1, %s3895_s26, %s167_s8  }
   0xb   : > { %p3988_p5 = por %p178_p2, %p177_p0  ;;  %p3992_p6 = por %p184_p4, %p183_p3 }
   0xc   : > { %p2792_p7 = scmp.ge.s32.totalorder %s3899_s27, 1  ;;  %p258_p8 = scmp.lt.s32.totalorder %s3899_s27, 5 }
   0xe   : > { %p259_p9 = pnand %p2792_p7, %p258_p8 }
  0x10   : > { %262 = sbr.rel (%p259_p9) target bundleno = 411 (0x19b), region = 44 }
  0x15   : > { %v2827_v0 = vld [vmem:[%s4911_s2 + $0x78] sm:$0xff]  ;;  %v2826_v2 = vld [vmem:[%s4911_s2 + $0x70] sm:$0xff]  ;;  %s2795_s19 = sshll.u32 %s3971_s28, 3  ;;  %v352_v3 = vlaneseq  ;;  %v3901_v4 = vmov 0.0   ;;  %v2825_v6 = vld [vmem:[%s4911_s2 + $0x68] sm:$0xff]  ;;  %vm394_vm0 = vcmask 523264  }
  0x16   : > { %v329_v1 = vld [vmem:[%s4913_s4 + $0x38] sm:$0xff]  ;;  %3362 = vmatprep.subr.mxu0 %v3901_v4  ;;  %3381 = vmatprep.subr.mxu1 %v2827_v0  ;;  %v328_v5 = vld [vmem:[%s4913_s4 + $0x30] sm:$0xff]  ;;  %p301_p10 = scmp.lt.s32.totalorder %s2795_s19, 31  ;;  %v327_v7 = vld [vmem:[%s4913_s4 + $0x28] sm:$0xff]  ;;  %v3902_v8 = vmov 1966171168  }
  0x17   : > { %3363 = vmatpush3.msra.mxu0 %v329_v1  ;;  %3382 = vmatpush3.msra.mxu1 %v2827_v0  ;;  %v350_v9 = vunpack.c.l.s4 %v3902_v8  ;;  %v353_v10 = vshrl.u32 %v352_v3, 7  ;;  %v2824_v11 = vld [vmem:[%s4911_s2 + $0x60] sm:$0xff]  ;;  %v2823_v13 = vld [vmem:[%s4911_s2 + $0x58] sm:$0xff]  ;;  %v2822_v24 = vld [vmem:[%s4911_s2 + $0x50] sm:$0xff]  ;;  %vm3903_vm1 = vmmov 0   ;;  %s3134_s14 = sshll.u32 %s3971_s28, 7 }
  0x18   : > { %3364 = vmatprep.subr.mxu0 %v3901_v4  ;;  %3383 = vmatprep.subr.mxu1 %v2826_v2  ;;  %s4968_s19 = smov (!%p301_p10, %s2795_s19), 31  ;;  %v326_v12 = vld [vmem:[%s4913_s4 + $0x20] sm:$0xff]  ;;  %v325_v14 = vld [vmem:[%s4913_s4 + $0x18] sm:$0xff]  ;;  %v324_v29 = vld [vmem:[%s4913_s4 + $0x10] sm:$0xff]  ;;  %s4605_s18 = scalar_lea.hbm %s4915_s6, %s3134_s14 }
  0x19   : > { %3365 = vmatpush3.msra.mxu0 %v328_v5  ;;  %3384 = vmatpush3.msra.mxu1 %v2826_v2  ;;  %s3757_s21 = smul.u32 144, %s4968_s19  ;;  %s303_s29 = scalar_lea.vmem %s4909_s0, %s4968_s19  ;;  %v351_v15 = vunpack.c.0.s8 %v350_v9  ;;  %v2821_v32 = vld [vmem:[%s4911_s2 + $0x48] sm:$0xff]  ;;  %v2820_v37 = vld [vmem:[%s4911_s2 + $0x40] sm:$0xff]  ;;  %v556_v45 = vld [vmem:[%s4911_s2 + $0x38] sm:$0xff] }
  0x1a   : > { %3366 = vmatprep.subr.mxu0 %v3901_v4  ;;  %3385 = vmatprep.subr.mxu1 %v2825_v6  ;;  %v314_v16 = vld [vmem:[%s303_s29] sm:$0x1]  ;;  %v315_v17 = vld [vmem:[%s303_s29 + $0x1] sm:$0x1]  ;;  %v316_v18 = vld [vmem:[%s303_s29 + $0x2] sm:$0x1] }
  0x1b   : > { %3367 = vmatpush3.msra.mxu0 %v327_v7  ;;  %3386 = vmatpush3.msra.mxu1 %v2825_v6  ;;  %v317_v19 = vld [vmem:[%s303_s29 + $0x3] sm:$0x1]  ;;  %v318_v20 = vld [vmem:[%s303_s29 + $0x4] sm:$0x1]  ;;  %v319_v21 = vld [vmem:[%s303_s29 + $0x5] sm:$0x1]  ;;  %v345_v22 = vcombine.low %v314_v16, %v315_v17  ;;  %v4040_v23 = vsub.s32 %v351_v15, %v353_v10  ;;  %s4064_s23 = scalar_lea.vmem %s4910_s1, %s3757_s21 }
  0x1c   : > { %3368 = vmatprep.subr.mxu0 %v3901_v4  ;;  %3387 = vmatprep.subr.mxu1 %v2824_v11  ;;  %v320_v25 = vld [vmem:[%s303_s29 + $0x6] sm:$0x1]  ;;  %v321_v26 = vld [vmem:[%s303_s29 + $0x7] sm:$0x1]  ;;  %v346_v27 = vcombine.low %v316_v18, %v317_v19  ;;  %v347_v28 = vcombine.low %v318_v20, %v319_v21  ;;  %v323_v35 = vld [vmem:[%s4913_s4 + $0x8] sm:$0xff]  ;;  %s4578_s19 = sand.u32 1, %s3891_s25  }
  0x1d   : > { %3369 = vmatpush3.msra.mxu0 %v326_v12  ;;  %3388 = vmatpush3.msra.mxu1 %v2824_v11  ;;  %v348_v30 = vcombine.low %v320_v25, %v321_v26  ;;  %v355_v31 = vrot.slane %v345_v22, %v4040_v23  ;;  %v322_v39 = vld [vmem:[%s4913_s4] sm:$0xff]  ;;  %v2804_v41 = vld [vmem:[%s4064_s23 + $0x18] sm:$0xff]  ;;  %v555_v48 = vld [vmem:[%s4911_s2 + $0x30] sm:$0xff]  ;;  %s2793_s13 = sshll.u32 %s4578_s19, 3  ;;  %s2651_s20 = scalar_lea.sflag [#allocation3], %s4578_s19 }
  0x1e   : > { %3370 = vmatprep.subr.mxu0 %v3901_v4  ;;  %3389 = vmatprep.subr.mxu1 %v2823_v13  ;;  %v362_v33 = vrot.slane %v346_v27, %v4040_v23  ;;  %v369_v34 = vrot.slane %v347_v28, %v4040_v23  ;;  %v2805_v44 = vld [vmem:[%s4064_s23 + $0x20] sm:$0xff]  ;;  %v2883_v46 = vld [vmem:[%s4911_s2 + $0xb8] sm:$0xff]  ;;  %v2806_v49 = vld [vmem:[%s4064_s23 + $0xa8] sm:$0xff]  ;;  %s3904_s29 = smov [#allocation2]  }
  0x1f   : > { %3371 = vmatpush3.msra.mxu0 %v325_v14  ;;  %3390 = vmatpush3.msra.mxu1 %v2823_v13  ;;  %v376_v36 = vrot.slane %v348_v30, %v4040_v23  ;;  %v2807_v50 = vld [vmem:[%s4064_s23 + $0xb0] sm:$0xff]  ;;  %v554_v51 = vld [vmem:[%s4911_s2 + $0x28] sm:$0xff]  ;;  %v553_v53 = vld [vmem:[%s4911_s2 + $0x20] sm:$0xff]  ;;  %s3813_s8 = sshll.u32 %s3904_s29, 4  ;;  %s3814_s8 = int_to_ptr.vmem [resolvable:$false] %s3813_s8 }
  0x20   : > { %3372 = vmatprep.subr.mxu0 %v3901_v4  ;;  %3391 = vmatprep.subr.mxu1 %v2822_v24  ;;  %v377_v38 = vcombine.low %v355_v31, %v362_v33  ;;  %v2882_v52 = vld [vmem:[%s4911_s2 + $0xb0] sm:$0xff]  ;;  %v2808_v54 = vld [vmem:[%s4064_s23 + $0x138] sm:$0xff]  ;;  %v2809_v55 = vld [vmem:[%s4064_s23 + $0x140] sm:$0xff]  ;;  %s3815_s9 = scalar_lea.vmem %s3814_s8, 256 }
  0x21   : > { %3373 = vmatpush3.msra.mxu0 %v324_v29  ;;  %3392 = vmatpush3.msra.mxu1 %v2822_v24  ;;  %v378_v40 = vcombine.low %v369_v34, %v376_v36  ;;  %v552_v56 = vld [vmem:[%s4911_s2 + $0x18] sm:$0xff]  ;;  %v2881_v57 = vld [vmem:[%s4911_s2 + $0xa8] sm:$0xff]  ;;  %v551_v58 = vld [vmem:[%s4911_s2 + $0x10] sm:$0xff] }
  0x22   : > { %3374 = vmatprep.subr.mxu0 %v3901_v4  ;;  %3393 = vmatprep.subr.mxu1 %v2821_v32  ;;  %v385_v42 = vrot.slane %v377_v38, %v4040_v23  ;;  %v2810_v59 = vld [vmem:[%s4064_s23 + $0x1c8] sm:$0xff]  ;;  %v2811_v60 = vld [vmem:[%s4064_s23 + $0x1d0] sm:$0xff]  ;;  %v2880_v62 = vld [vmem:[%s4911_s2 + $0xa0] sm:$0xff] }
  0x23   : > { %3375 = vmatpush3.msra.mxu0 %v323_v35  ;;  %3394 = vmatpush3.msra.mxu1 %v2821_v32  ;;  %v392_v43 = vrot.slane %v378_v40, %v4040_v23  ;;  %v550_v61 = vld [vmem:[%s4911_s2 + $0x8] sm:$0xff]  ;;  %v549_v63 = vld [vmem:[%s4911_s2] sm:$0xff]  ;;  %v2812_v0 = vld [vmem:[%s4064_s23 + $0x258] sm:$0xff] }
  0x24   : > { %3376 = vmatprep.subr.mxu0 %v3901_v4  ;;  %3395 = vmatprep.subr.mxu1 %v2820_v37  ;;  %v533_v1 = vld [vmem:[%s4064_s23] sm:$0xff]  ;;  %v534_v3 = vld [vmem:[%s4064_s23 + $0x8] sm:$0xff]  ;;  %v2923_v5 = vld [vmem:[%s4911_s2 + $0xf8] sm:$0xff] }
  0x25   : > { %3377 = vmatpush3.msra.mxu0 %v322_v39  ;;  %3378 = vmatprep.mubr.msk.f32.mxu0 %vm3903_vm1, %v3901_v4  ;;  %v393_v47 = vcombine.low %v385_v42, %v392_v43  ;;  %v2813_v2 = vld [vmem:[%s4064_s23 + $0x260] sm:$0xff]  ;;  %v2879_v4 = vld [vmem:[%s4911_s2 + $0x98] sm:$0xff]  ;;  %v2814_v6 = vld [vmem:[%s4064_s23 + $0x2e8] sm:$0xff] }
  0x26   : > { %3396 = vmatpush3.msra.mxu1 %v2820_v37  ;;  %3397 = vmatprep.mubr.msk.f32.mxu1 %vm394_vm0, %v2804_v41  ;;  %v535_v7 = vld [vmem:[%s4064_s23 + $0x90] sm:$0xff]  ;;  %v536_v9 = vld [vmem:[%s4064_s23 + $0x98] sm:$0xff]  ;;  %v537_v13 = vld [vmem:[%s4064_s23 + $0x120] sm:$0xff] }
  0x27   : > { %3398 = vmatmul.mubr.msk.f32.vlgmr.msra.gmra.mxu1 %vm394_vm0, %v2805_v44  ;;  %3421 = vmatprep.subr.mxu0 %v556_v45  ;;  %v2815_v8 = vld [vmem:[%s4064_s23 + $0x2f0] sm:$0xff]  ;;  %v2816_v12 = vld [vmem:[%s4064_s23 + $0x378] sm:$0xff]  ;;  %v2817_v14 = vld [vmem:[%s4064_s23 + $0x380] sm:$0xff] }
  0x28   : > { %3379 = vmatmul.mubr.msk.f32.vlgmr.msra.gmra.mxu0 %vm394_vm0, %v393_v47  ;;  %3461 = vmatprep.subr.mxu1 %v2883_v46  ;;  %v2878_v10 = vld [vmem:[%s4911_s2 + $0x90] sm:$0xff]  ;;  %v538_v15 = vld [vmem:[%s4064_s23 + $0x128] sm:$0xff]  ;;  %v540_v21 = vld [vmem:[%s4064_s23 + $0x1b8] sm:$0xff] }
  0x29   : > { %3422 = vmatpush3.msra.mxu0 %v556_v45  ;;  %3462 = vmatpush3.msra.mxu1 %v2883_v46  ;;  %v2922_v11 = vld [vmem:[%s4911_s2 + $0xf0] sm:$0xff]  ;;  %v2877_v16 = vld [vmem:[%s4911_s2 + $0x88] sm:$0xff]  ;;  %v2876_v22 = vld [vmem:[%s4911_s2 + $0x80] sm:$0xff] }
  0x2a   : > { %3423 = vmatprep.subr.mxu0 %v555_v48  ;;  %3400 = vmatprep.mubr.msk.f32.mxu1 %vm394_vm0, %v2806_v49  ;;  %v2921_v17 = vld [vmem:[%s4911_s2 + $0xe8] sm:$0xff]  ;;  %v539_v19 = vld [vmem:[%s4064_s23 + $0x1b0] sm:$0xff]  ;;  %v2920_v24 = vld [vmem:[%s4911_s2 + $0xe0] sm:$0xff] }
  0x2b   : > { %3424 = vmatpush3.msra.mxu0 %v555_v48  ;;  %3401 = vmatmul.mubr.msk.f32.gmra.mxu1 %vm394_vm0, %v2807_v50  ;;  %v2818_v18 = vld [vmem:[%s4064_s23 + $0x408] sm:$0xff]  ;;  %v2819_v20 = vld [vmem:[%s4064_s23 + $0x410] sm:$0xff]  ;;  %v541_v25 = vld [vmem:[%s4064_s23 + $0x240] sm:$0xff] }
  0x2c   : > { %3425 = vmatprep.subr.mxu0 %v554_v51  ;;  %3463 = vmatprep.subr.mxu1 %v2882_v52  ;;  %v2860_v26 = vld [vmem:[%s4064_s23 + $0x30] sm:$0xff]  ;;  %v542_v27 = vld [vmem:[%s4064_s23 + $0x248] sm:$0xff]  ;;  %v2861_v28 = vld [vmem:[%s4064_s23 + $0x38] sm:$0xff] }
  0x2d   : > { %3426 = vmatpush3.msra.mxu0 %v554_v51  ;;  %3464 = vmatpush3.msra.mxu1 %v2882_v52  ;;  %v2919_v29 = vld [vmem:[%s4911_s2 + $0xd8] sm:$0xff]  ;;  %v543_v31 = vld [vmem:[%s4064_s23 + $0x2d0] sm:$0xff]  ;;  %v2862_v32 = vld [vmem:[%s4064_s23 + $0xc0] sm:$0xff] }
  0x2e   : > { %3427 = vmatprep.subr.mxu0 %v553_v53  ;;  %3403 = vmatprep.mubr.msk.f32.mxu1 %vm394_vm0, %v2808_v54  ;;  %v2963_v30 = vld [vmem:[%s4911_s2 + $0x138] sm:$0xff]  ;;  %v2863_v34 = vld [vmem:[%s4064_s23 + $0xc8] sm:$0xff]  ;;  %v2918_v35 = vld [vmem:[%s4911_s2 + $0xd0] sm:$0xff] }
  0x2f   : > { %3428 = vmatpush3.msra.mxu0 %v553_v53  ;;  %3404 = vmatmul.mubr.msk.f32.gmra.mxu1 %vm394_vm0, %v2809_v55  ;;  %v544_v33 = vld [vmem:[%s4064_s23 + $0x2d8] sm:$0xff]  ;;  %v2962_v36 = vld [vmem:[%s4911_s2 + $0x130] sm:$0xff]  ;;  %v545_v37 = vld [vmem:[%s4064_s23 + $0x360] sm:$0xff] }
  0x30   : > { %3429 = vmatprep.subr.mxu0 %v552_v56  ;;  %3465 = vmatprep.subr.mxu1 %v2881_v57  ;;  %v2864_v38 = vld [vmem:[%s4064_s23 + $0x150] sm:$0xff]  ;;  %v546_v39 = vld [vmem:[%s4064_s23 + $0x368] sm:$0xff]  ;;  %v2865_v40 = vld [vmem:[%s4064_s23 + $0x158] sm:$0xff] }
  0x31   : > { %3430 = vmatpush3.msra.mxu0 %v552_v56  ;;  %3466 = vmatpush3.msra.mxu1 %v2881_v57  ;;  %v2917_v41 = vld [vmem:[%s4911_s2 + $0xc8] sm:$0xff]  ;;  %v547_v43 = vld [vmem:[%s4064_s23 + $0x3f0] sm:$0xff]  ;;  %v2866_v44 = vld [vmem:[%s4064_s23 + $0x1e0] sm:$0xff] }
  0x32   : > { %3431 = vmatprep.subr.mxu0 %v551_v58  ;;  %3406 = vmatprep.mubr.msk.f32.mxu1 %vm394_vm0, %v2810_v59  ;;  %v2961_v42 = vld [vmem:[%s4911_s2 + $0x128] sm:$0xff]  ;;  %v548_v45 = vld [vmem:[%s4064_s23 + $0x3f8] sm:$0xff]  ;;  %v2916_v47 = vld [vmem:[%s4911_s2 + $0xc0] sm:$0xff] }
  0x33   : > { %3432 = vmatpush3.msra.mxu0 %v551_v58  ;;  %3407 = vmatmul.mubr.msk.f32.gmra.mxu1 %vm394_vm0, %v2811_v60  ;;  %v2867_v46 = vld [vmem:[%s4064_s23 + $0x1e8] sm:$0xff]  ;;  %v2960_v48 = vld [vmem:[%s4911_s2 + $0x120] sm:$0xff]  ;;  %v2868_v49 = vld [vmem:[%s4064_s23 + $0x270] sm:$0xff] }
  0x34   : > { %3433 = vmatprep.subr.mxu0 %v550_v61  ;;  %3467 = vmatprep.subr.mxu1 %v2880_v62  ;;  %v2900_v50 = vld [vmem:[%s4064_s23 + $0x48] sm:$0xff]  ;;  %v2869_v51 = vld [vmem:[%s4064_s23 + $0x278] sm:$0xff]  ;;  %v2901_v52 = vld [vmem:[%s4064_s23 + $0x50] sm:$0xff] }
  0x35   : > { %3434 = vmatpush3.msra.mxu0 %v550_v61  ;;  %3468 = vmatpush3.msra.mxu1 %v2880_v62  ;;  %v2959_v53 = vld [vmem:[%s4911_s2 + $0x118] sm:$0xff]  ;;  %v2870_v55 = vld [vmem:[%s4064_s23 + $0x300] sm:$0xff]  ;;  %v2871_v57 = vld [vmem:[%s4064_s23 + $0x308] sm:$0xff] }
  0x36   : > { %3435 = vmatprep.subr.mxu0 %v549_v63  ;;  %3409 = vmatprep.mubr.msk.f32.mxu1 %vm394_vm0, %v2812_v0  ;;  %v3003_v54 = vld [vmem:[%s4911_s2 + $0x178] sm:$0xff]  ;;  %v2903_v58 = vld [vmem:[%s4064_s23 + $0xe0] sm:$0xff]  ;;  %v2958_v59 = vld [vmem:[%s4911_s2 + $0x110] sm:$0xff] }
  0x37   : > { %3436 = vmatpush3.msra.mxu0 %v549_v63  ;;  %3437 = vmatprep.mubr.msk.f32.mxu0 %vm394_vm0, %v533_v1  ;;  %v2902_v56 = vld [vmem:[%s4064_s23 + $0xd8] sm:$0xff]  ;;  %v3002_v60 = vld [vmem:[%s4911_s2 + $0x170] sm:$0xff]  ;;  %v2904_v62 = vld [vmem:[%s4064_s23 + $0x168] sm:$0xff] }
  0x38   : > { %3410 = vmatmul.mubr.msk.f32.gmra.mxu1 %vm394_vm0, %v2813_v2  ;;  %3438 = vmatmul.mubr.msk.f32.vlgmr.msra.gmra.mxu0 %vm394_vm0, %v534_v3  ;;  %v2872_v61 = vld [vmem:[%s4064_s23 + $0x390] sm:$0xff]  ;;  %v2873_v63 = vld [vmem:[%s4064_s23 + $0x398] sm:$0xff]  ;;  %v2957_v1 = vld [vmem:[%s4911_s2 + $0x108] sm:$0xff] }
  0x39   : > { %3469 = vmatprep.subr.mxu1 %v2879_v4  ;;  %3501 = vmatprep.subr.mxu0 %v2923_v5  ;;  %v2905_v0 = vld [vmem:[%s4064_s23 + $0x170] sm:$0xff]  ;;  %v3001_v2 = vld [vmem:[%s4911_s2 + $0x168] sm:$0xff]  ;;  %v2874_v3 = vld [vmem:[%s4064_s23 + $0x420] sm:$0xff] }
  0x3a   : > { %3470 = vmatpush3.msra.mxu1 %v2879_v4  ;;  %3502 = vmatpush3.msra.mxu0 %v2923_v5  ;;  %v2906_v4 = vld [vmem:[%s4064_s23 + $0x1f8] sm:$0xff]  ;;  %v2875_v5 = vld [vmem:[%s4064_s23 + $0x428] sm:$0xff] }
  0x3b   : > { %3412 = vmatprep.mubr.msk.f32.mxu1 %vm394_vm0, %v2814_v6  ;;  %3440 = vmatprep.mubr.msk.f32.mxu0 %vm394_vm0, %v535_v7  ;;  %v2907_v6 = vld [vmem:[%s4064_s23 + $0x200] sm:$0xff] }
  0x3c   : > { %3413 = vmatmul.mubr.msk.f32.gmra.mxu1 %vm394_vm0, %v2815_v8  ;;  %3441 = vmatmul.mubr.msk.f32.gmra.mxu0 %vm394_vm0, %v536_v9  ;;  %v2956_v7 = vld [vmem:[%s4911_s2 + $0x100] sm:$0xff]  ;;  %v2908_v9 = vld [vmem:[%s4064_s23 + $0x288] sm:$0xff] }
  0x3d   : > { %3471 = vmatprep.subr.mxu1 %v2878_v10  ;;  %3503 = vmatprep.subr.mxu0 %v2922_v11  ;;  %v3000_v8 = vld [vmem:[%s4911_s2 + $0x160] sm:$0xff] }
  0x3e   : > { %3472 = vmatpush3.msra.mxu1 %v2878_v10  ;;  %3504 = vmatpush3.msra.mxu0 %v2922_v11  ;;  %v2940_v10 = vld [vmem:[%s4064_s23 + $0x60] sm:$0xff]  ;;  %v2909_v11 = vld [vmem:[%s4064_s23 + $0x290] sm:$0xff] }
  0x3f   : > { %3415 = vmatprep.mubr.msk.f32.mxu1 %vm394_vm0, %v2816_v12  ;;  %3443 = vmatprep.mubr.msk.f32.mxu0 %vm394_vm0, %v537_v13  ;;  %v2941_v12 = vld [vmem:[%s4064_s23 + $0x68] sm:$0xff]  ;;  %v2999_v13 = vld [vmem:[%s4911_s2 + $0x158] sm:$0xff] }
  0x40   : > { %3416 = vmatmul.mubr.msk.f32.gmra.mxu1 %vm394_vm0, %v2817_v14  ;;  %3444 = vmatmul.mubr.msk.f32.gmra.mxu0 %vm394_vm0, %v538_v15  ;;  %v3027_v14 = vld [vmem:[%s4911_s2 + $0x1b8] sm:$0xff] }
  0x41   : > { %3473 = vmatprep.subr.mxu1 %v2877_v16  ;;  %3505 = vmatprep.subr.mxu0 %v2921_v17  ;;  %v2910_v15 = vld [vmem:[%s4064_s23 + $0x318] sm:$0xff] }
  0x42   : > { %3474 = vmatpush3.msra.mxu1 %v2877_v16  ;;  %3506 = vmatpush3.msra.mxu0 %v2921_v17  ;;  %v2942_v16 = vld [vmem:[%s4064_s23 + $0xf0] sm:$0xff]  ;;  %v2911_v17 = vld [vmem:[%s4064_s23 + $0x320] sm:$0xff] }
  0x43   : > { %3418 = vmatprep.mubr.msk.f32.mxu1 %vm394_vm0, %v2818_v18  ;;  %3446 = vmatprep.mubr.msk.f32.mxu0 %vm394_vm0, %v539_v19  ;;  %v2943_v18 = vld [vmem:[%s4064_s23 + $0xf8] sm:$0xff]  ;;  %v2998_v19 = vld [vmem:[%s4911_s2 + $0x150] sm:$0xff] }
  0x44   : > { %3419 = vmatmul.mubr.msk.f32.gmra.mxu1 %vm394_vm0, %v2819_v20  ;;  %3447 = vmatmul.mubr.msk.f32.gmra.mxu0 %vm394_vm0, %v540_v21  ;;  %v3026_v20 = vld [vmem:[%s4911_s2 + $0x1b0] sm:$0xff]  ;;  %v2912_v21 = vld [vmem:[%s4064_s23 + $0x3a8] sm:$0xff] }
  0x45   : > { %3475 = vmatprep.subr.mxu1 %v2876_v22  ;;  %3507 = vmatprep.subr.mxu0 %v2920_v24 }
  0x46   : > { %3476 = vmatpush3.msra.mxu1 %v2876_v22  ;;  %3508 = vmatpush3.msra.mxu0 %v2920_v24  ;;  %v2944_v22 = vld [vmem:[%s4064_s23 + $0x180] sm:$0xff]  ;;  %v2913_v24 = vld [vmem:[%s4064_s23 + $0x3b0] sm:$0xff] }
  0x47   : > { %3449 = vmatprep.mubr.msk.f32.mxu0 %vm394_vm0, %v541_v25  ;;  %3477 = vmatprep.mubr.msk.f32.mxu1 %vm394_vm0, %v2860_v26  ;;  %v2945_v25 = vld [vmem:[%s4064_s23 + $0x188] sm:$0xff] }
  0x48   : > { %3450 = vmatmul.mubr.msk.f32.gmra.mxu0 %vm394_vm0, %v542_v27  ;;  %3478 = vmatmul.mubr.msk.f32.vlgmr.msra.gmra.mxu1 %vm394_vm0, %v2861_v28  ;;  %v2997_v26 = vld [vmem:[%s4911_s2 + $0x148] sm:$0xff]  ;;  %v2914_v28 = vld [vmem:[%s4064_s23 + $0x438] sm:$0xff] }
  0x49   : > { %3509 = vmatprep.subr.mxu0 %v2919_v29  ;;  %3541 = vmatprep.subr.mxu1 %v2963_v30  ;;  %v3025_v27 = vld [vmem:[%s4911_s2 + $0x1a8] sm:$0xff] }
  0x4a   : > { %3510 = vmatpush3.msra.mxu0 %v2919_v29  ;;  %3542 = vmatpush3.msra.mxu1 %v2963_v30  ;;  %v2946_v29 = vld [vmem:[%s4064_s23 + $0x210] sm:$0xff]  ;;  %v2915_v30 = vld [vmem:[%s4064_s23 + $0x440] sm:$0xff] }
  0x4b   : > { %3452 = vmatprep.mubr.msk.f32.mxu0 %vm394_vm0, %v543_v31  ;;  %3480 = vmatprep.mubr.msk.f32.mxu1 %vm394_vm0, %v2862_v32  ;;  %v2947_v31 = vld [vmem:[%s4064_s23 + $0x218] sm:$0xff]  ;;  %v2996_v32 = vld [vmem:[%s4911_s2 + $0x140] sm:$0xff] }
  0x4c   : > { %3453 = vmatmul.mubr.msk.f32.gmra.mxu0 %vm394_vm0, %v544_v33  ;;  %3481 = vmatmul.mubr.msk.f32.gmra.mxu1 %vm394_vm0, %v2863_v34  ;;  %v3024_v33 = vld [vmem:[%s4911_s2 + $0x1a0] sm:$0xff] }
  0x4d   : > { %3511 = vmatprep.subr.mxu0 %v2918_v35  ;;  %3543 = vmatprep.subr.mxu1 %v2962_v36  ;;  %v2948_v34 = vld [vmem:[%s4064_s23 + $0x2a0] sm:$0xff] }
  0x4e   : > { %3512 = vmatpush3.msra.mxu0 %v2918_v35  ;;  %3544 = vmatpush3.msra.mxu1 %v2962_v36  ;;  %v2980_v35 = vld [vmem:[%s4064_s23 + $0x78] sm:$0xff]  ;;  %v2949_v36 = vld [vmem:[%s4064_s23 + $0x2a8] sm:$0xff] }
  0x4f   : > { %3455 = vmatprep.mubr.msk.f32.mxu0 %vm394_vm0, %v545_v37  ;;  %3483 = vmatprep.mubr.msk.f32.mxu1 %vm394_vm0, %v2864_v38  ;;  %v2981_v37 = vld [vmem:[%s4064_s23 + $0x80] sm:$0xff]  ;;  %v3023_v38 = vld [vmem:[%s4911_s2 + $0x198] sm:$0xff] }
  0x50   : > { %3456 = vmatmul.mubr.msk.f32.gmra.mxu0 %vm394_vm0, %v546_v39  ;;  %3484 = vmatmul.mubr.msk.f32.gmra.mxu1 %vm394_vm0, %v2865_v40  ;;  %v3067_v39 = vld [vmem:[%s4911_s2 + $0x1f8] sm:$0xff]  ;;  %v2950_v40 = vld [vmem:[%s4064_s23 + $0x330] sm:$0xff] }
  0x51   : > { %3513 = vmatprep.subr.mxu0 %v2917_v41  ;;  %3545 = vmatprep.subr.mxu1 %v2961_v42 }
  0x52   : > { %3514 = vmatpush3.msra.mxu0 %v2917_v41  ;;  %3546 = vmatpush3.msra.mxu1 %v2961_v42  ;;  %v2982_v41 = vld [vmem:[%s4064_s23 + $0x108] sm:$0xff]  ;;  %v2951_v42 = vld [vmem:[%s4064_s23 + $0x338] sm:$0xff] }
  0x53   : > { %3458 = vmatprep.mubr.msk.f32.mxu0 %vm394_vm0, %v547_v43  ;;  %3486 = vmatprep.mubr.msk.f32.mxu1 %vm394_vm0, %v2866_v44  ;;  %v2983_v43 = vld [vmem:[%s4064_s23 + $0x110] sm:$0xff] }
  0x54   : > { %3459 = vmatmul.mubr.msk.f32.gmra.mxu0 %vm394_vm0, %v548_v45  ;;  %3487 = vmatmul.mubr.msk.f32.gmra.mxu1 %vm394_vm0, %v2867_v46  ;;  %v3022_v44 = vld [vmem:[%s4911_s2 + $0x190] sm:$0xff]  ;;  %v2952_v46 = vld [vmem:[%s4064_s23 + $0x3c0] sm:$0xff] }
  0x55   : > { %3515 = vmatprep.subr.mxu0 %v2916_v47  ;;  %3547 = vmatprep.subr.mxu1 %v2960_v48  ;;  %v3066_v45 = vld [vmem:[%s4911_s2 + $0x1f0] sm:$0xff] }
  0x56   : > { %3516 = vmatpush3.msra.mxu0 %v2916_v47  ;;  %3548 = vmatpush3.msra.mxu1 %v2960_v48  ;;  %v2984_v47 = vld [vmem:[%s4064_s23 + $0x198] sm:$0xff]  ;;  %v2953_v48 = vld [vmem:[%s4064_s23 + $0x3c8] sm:$0xff] }
  0x57   : > { %3489 = vmatprep.mubr.msk.f32.mxu1 %vm394_vm0, %v2868_v49  ;;  %3517 = vmatprep.mubr.msk.f32.mxu0 %vm394_vm0, %v2900_v50  ;;  %v2985_v49 = vld [vmem:[%s4064_s23 + $0x1a0] sm:$0xff]  ;;  %v3021_v50 = vld [vmem:[%s4911_s2 + $0x188] sm:$0xff] }
  0x58   : > { %3490 = vmatmul.mubr.msk.f32.gmra.mxu1 %vm394_vm0, %v2869_v51  ;;  %3518 = vmatmul.mubr.msk.f32.vlgmr.msra.gmra.mxu0 %vm394_vm0, %v2901_v52  ;;  %v3065_v51 = vld [vmem:[%s4911_s2 + $0x1e8] sm:$0xff]  ;;  %v2954_v52 = vld [vmem:[%s4064_s23 + $0x450] sm:$0xff] }
  0x59   : > { %3549 = vmatprep.subr.mxu1 %v2959_v53  ;;  %3581 = vmatprep.subr.mxu0 %v3003_v54 }
  0x5a   : > { %3550 = vmatpush3.msra.mxu1 %v2959_v53  ;;  %3582 = vmatpush3.msra.mxu0 %v3003_v54  ;;  %v2986_v53 = vld [vmem:[%s4064_s23 + $0x228] sm:$0xff]  ;;  %v2955_v54 = vld [vmem:[%s4064_s23 + $0x458] sm:$0xff] }
  0x5b   : > { %3492 = vmatprep.mubr.msk.f32.mxu1 %vm394_vm0, %v2870_v55  ;;  %3520 = vmatprep.mubr.msk.f32.mxu0 %vm394_vm0, %v2902_v56  ;;  %v2987_v55 = vld [vmem:[%s4064_s23 + $0x230] sm:$0xff]  ;;  %v3020_v56 = vld [vmem:[%s4911_s2 + $0x180] sm:$0xff] }
  0x5c   : > { %3493 = vmatmul.mubr.msk.f32.gmra.mxu1 %vm394_vm0, %v2871_v57  ;;  %3521 = vmatmul.mubr.msk.f32.gmra.mxu0 %vm394_vm0, %v2903_v58  ;;  %v3064_v57 = vld [vmem:[%s4911_s2 + $0x1e0] sm:$0xff]  ;;  %v2988_v58 = vld [vmem:[%s4064_s23 + $0x2b8] sm:$0xff] }
  0x5d   : > { %3551 = vmatprep.subr.mxu1 %v2958_v59  ;;  %3583 = vmatprep.subr.mxu0 %v3002_v60 }
  0x5e   : > { %3552 = vmatpush3.msra.mxu1 %v2958_v59  ;;  %3584 = vmatpush3.msra.mxu0 %v3002_v60  ;;  %v1909_v59 = vld [vmem:[%s4064_s23 + $0x4] sm:$0xff] }
  0x5f   : > { %3495 = vmatprep.mubr.msk.f32.mxu1 %vm394_vm0, %v2872_v61  ;;  %3523 = vmatprep.mubr.msk.f32.mxu0 %vm394_vm0, %v2904_v62  ;;  %v2989_v60 = vld [vmem:[%s4064_s23 + $0x2c0] sm:$0xff]  ;;  %v1910_v61 = vld [vmem:[%s4064_s23 + $0xc] sm:$0xff]  ;;  %v3063_v62 = vld [vmem:[%s4911_s2 + $0x1d8] sm:$0xff] }
  0x60   : > { %3496 = vmatmul.mubr.msk.f32.gmra.mxu1 %vm394_vm0, %v2873_v63  ;;  %3524 = vmatmul.mubr.msk.f32.gmra.mxu0 %vm394_vm0, %v2905_v0  ;;  %v4421_v63 = vld [vmem:[%s4911_s2 + $0x238] sm:$0xff]  ;;  %v2990_v0 = vld [vmem:[%s4064_s23 + $0x348] sm:$0xff] }
  0x61   : > { %3553 = vmatprep.subr.mxu1 %v2957_v1  ;;  %3585 = vmatprep.subr.mxu0 %v3001_v2 }
  0x62   : > { %3554 = vmatpush3.msra.mxu1 %v2957_v1  ;;  %3586 = vmatpush3.msra.mxu0 %v3001_v2  ;;  %v1911_v1 = vld [vmem:[%s4064_s23 + $0x94] sm:$0xff] }
  0x63   : > { %3498 = vmatprep.mubr.msk.f32.mxu1 %vm394_vm0, %v2874_v3  ;;  %3526 = vmatprep.mubr.msk.f32.mxu0 %vm394_vm0, %v2906_v4  ;;  %v2991_v2 = vld [vmem:[%s4064_s23 + $0x350] sm:$0xff]  ;;  %v1912_v3 = vld [vmem:[%s4064_s23 + $0x9c] sm:$0xff] }
  0x64   : > { %3499 = vmatmul.mubr.msk.f32.gmra.mxu1 %vm394_vm0, %v2875_v5  ;;  %3527 = vmatmul.mubr.msk.f32.gmra.mxu0 %vm394_vm0, %v2907_v6  ;;  %v3062_v4 = vld [vmem:[%s4911_s2 + $0x1d0] sm:$0xff]  ;;  %v2992_v6 = vld [vmem:[%s4064_s23 + $0x3d8] sm:$0xff] }
  0x65   : > { %3555 = vmatprep.subr.mxu1 %v2956_v7  ;;  %3587 = vmatprep.subr.mxu0 %v3000_v8  ;;  %v4439_v5 = vld [vmem:[%s4911_s2 + $0x230] sm:$0xff] }
  0x66   : > { %3556 = vmatpush3.msra.mxu1 %v2956_v7  ;;  %3588 = vmatpush3.msra.mxu0 %v3000_v8  ;;  %v1913_v7 = vld [vmem:[%s4064_s23 + $0x124] sm:$0xff] }
  0x67   : > { %3529 = vmatprep.mubr.msk.f32.mxu0 %vm394_vm0, %v2908_v9  ;;  %3557 = vmatprep.mubr.msk.f32.mxu1 %vm394_vm0, %v2940_v10  ;;  %v2993_v8 = vld [vmem:[%s4064_s23 + $0x3e0] sm:$0xff]  ;;  %v1914_v9 = vld [vmem:[%s4064_s23 + $0x12c] sm:$0xff] }
  0x68   : > { %3530 = vmatmul.mubr.msk.f32.gmra.mxu0 %vm394_vm0, %v2909_v11  ;;  %3558 = vmatmul.mubr.msk.f32.vlgmr.msra.gmra.mxu1 %vm394_vm0, %v2941_v12  ;;  %v3061_v10 = vld [vmem:[%s4911_s2 + $0x1c8] sm:$0xff] }
  0x69   : > { %3589 = vmatprep.subr.mxu0 %v2999_v13  ;;  %3621 = vmatprep.subr.mxu1 %v3027_v14  ;;  %v4457_v11 = vld [vmem:[%s4911_s2 + $0x228] sm:$0xff] }
  0x6a   : > { %3590 = vmatpush3.msra.mxu0 %v2999_v13  ;;  %3622 = vmatpush3.msra.mxu1 %v3027_v14  ;;  %v2994_v12 = vld [vmem:[%s4064_s23 + $0x468] sm:$0xff]  ;;  %v1915_v13 = vld [vmem:[%s4064_s23 + $0x1b4] sm:$0xff] }
  0x6b   : > { %3532 = vmatprep.mubr.msk.f32.mxu0 %vm394_vm0, %v2910_v15  ;;  %3560 = vmatprep.mubr.msk.f32.mxu1 %vm394_vm0, %v2942_v16  ;;  %v2995_v14 = vld [vmem:[%s4064_s23 + $0x470] sm:$0xff]  ;;  %v1916_v15 = vld [vmem:[%s4064_s23 + $0x1bc] sm:$0xff] }
  0x6c   : > { %3533 = vmatmul.mubr.msk.f32.gmra.mxu0 %vm394_vm0, %v2911_v17  ;;  %3561 = vmatmul.mubr.msk.f32.gmra.mxu1 %vm394_vm0, %v2943_v18  ;;  %v3060_v16 = vld [vmem:[%s4911_s2 + $0x1c0] sm:$0xff] }
  0x6d   : > { %3591 = vmatprep.subr.mxu0 %v2998_v19  ;;  %3623 = vmatprep.subr.mxu1 %v3026_v20  ;;  %v3104_v17 = vld [vmem:[%s4911_s2 + $0x220] sm:$0xff] }
  0x6e   : > { %3592 = vmatpush3.msra.mxu0 %v2998_v19  ;;  %3624 = vmatpush3.msra.mxu1 %v3026_v20  ;;  %v1917_v18 = vld [vmem:[%s4064_s23 + $0x244] sm:$0xff]  ;;  %v3044_v19 = vld [vmem:[%s4064_s23 + $0x1c] sm:$0xff]  ;;  %v1918_v20 = vld [vmem:[%s4064_s23 + $0x24c] sm:$0xff] }
  0x6f   : > { %3535 = vmatprep.mubr.msk.f32.mxu0 %vm394_vm0, %v2912_v21  ;;  %3563 = vmatprep.mubr.msk.f32.mxu1 %vm394_vm0, %v2944_v22  ;;  %v3045_v21 = vld [vmem:[%s4064_s23 + $0x24] sm:$0xff]  ;;  %v3103_v22 = vld [vmem:[%s4911_s2 + $0x218] sm:$0xff] }
  0x70   : > { %3536 = vmatmul.mubr.msk.f32.gmra.mxu0 %vm394_vm0, %v2913_v24  ;;  %3564 = vmatmul.mubr.msk.f32.gmra.mxu1 %vm394_vm0, %v2945_v25  ;;  %v1919_v24 = vld [vmem:[%s4064_s23 + $0x2d4] sm:$0xff]  ;;  %v3046_v25 = vld [vmem:[%s4064_s23 + $0xac] sm:$0xff] }
  0x71   : > { %3593 = vmatprep.subr.mxu0 %v2997_v26  ;;  %3625 = vmatprep.subr.mxu1 %v3025_v27 }
  0x72   : > { %3594 = vmatpush3.msra.mxu0 %v2997_v26  ;;  %3626 = vmatpush3.msra.mxu1 %v3025_v27  ;;  %v1920_v26 = vld [vmem:[%s4064_s23 + $0x2dc] sm:$0xff]  ;;  %v3047_v27 = vld [vmem:[%s4064_s23 + $0xb4] sm:$0xff] }
  0x73   : > { %3538 = vmatprep.mubr.msk.f32.mxu0 %vm394_vm0, %v2914_v28  ;;  %3566 = vmatprep.mubr.msk.f32.mxu1 %vm394_vm0, %v2946_v29  ;;  %v3102_v28 = vld [vmem:[%s4911_s2 + $0x210] sm:$0xff]  ;;  %v1921_v29 = vld [vmem:[%s4064_s23 + $0x364] sm:$0xff] }
  0x74   : > { %3539 = vmatmul.mubr.msk.f32.gmra.mxu0 %vm394_vm0, %v2915_v30  ;;  %3567 = vmatmul.mubr.msk.f32.gmra.mxu1 %vm394_vm0, %v2947_v31  ;;  %v3048_v30 = vld [vmem:[%s4064_s23 + $0x13c] sm:$0xff]  ;;  %v1922_v31 = vld [vmem:[%s4064_s23 + $0x36c] sm:$0xff] }
  0x75   : > { %3595 = vmatprep.subr.mxu0 %v2996_v32  ;;  %3627 = vmatprep.subr.mxu1 %v3024_v33 }
  0x76   : > { %3596 = vmatpush3.msra.mxu0 %v2996_v32  ;;  %3628 = vmatpush3.msra.mxu1 %v3024_v33  ;;  %v3049_v32 = vld [vmem:[%s4064_s23 + $0x144] sm:$0xff] }
  0x77   : > { %3569 = vmatprep.mubr.msk.f32.mxu1 %vm394_vm0, %v2948_v34  ;;  %3597 = vmatprep.mubr.msk.f32.mxu0 %vm394_vm0, %v2980_v35  ;;  %v3101_v33 = vld [vmem:[%s4911_s2 + $0x208] sm:$0xff]  ;;  %v1923_v34 = vld [vmem:[%s4064_s23 + $0x3f4] sm:$0xff] }
  0x78   : > { %3570 = vmatmul.mubr.msk.f32.gmra.mxu1 %vm394_vm0, %v2949_v36  ;;  %3598 = vmatmul.mubr.msk.f32.vlgmr.msra.gmra.mxu0 %vm394_vm0, %v2981_v37  ;;  %v3050_v35 = vld [vmem:[%s4064_s23 + $0x1cc] sm:$0xff]  ;;  %v1924_v36 = vld [vmem:[%s4064_s23 + $0x3fc] sm:$0xff]  ;;  %v3051_v37 = vld [vmem:[%s4064_s23 + $0x1d4] sm:$0xff] }
  0x79   : > { %3629 = vmatprep.subr.mxu1 %v3023_v38  ;;  %3661 = vmatprep.subr.mxu0 %v3067_v39 }
  0x7a   : > { %3630 = vmatpush3.msra.mxu1 %v3023_v38  ;;  %3662 = vmatpush3.msra.mxu0 %v3067_v39  ;;  %v3100_v38 = vld [vmem:[%s4911_s2 + $0x200] sm:$0xff] }
  0x7b   : > { %3572 = vmatprep.mubr.msk.f32.mxu1 %vm394_vm0, %v2950_v40  ;;  %3600 = vmatprep.mubr.msk.f32.mxu0 %vm394_vm0, %v2982_v41  ;;  %v3052_v39 = vld [vmem:[%s4064_s23 + $0x25c] sm:$0xff]  ;;  %v3088_v40 = vld [vmem:[%s4064_s23 + $0x154] sm:$0xff]  ;;  %v3053_v41 = vld [vmem:[%s4064_s23 + $0x264] sm:$0xff] }
  0x7c   : > { %3573 = vmatmul.mubr.msk.f32.gmra.mxu1 %vm394_vm0, %v2951_v42  ;;  %3601 = vmatmul.mubr.msk.f32.gmra.mxu0 %vm394_vm0, %v2983_v43  ;;  %v3089_v42 = vld [vmem:[%s4064_s23 + $0x15c] sm:$0xff]  ;;  %v3054_v43 = vld [vmem:[%s4064_s23 + $0x2ec] sm:$0xff] }
  0x7d   : > { %3631 = vmatprep.subr.mxu1 %v3022_v44  ;;  %3663 = vmatprep.subr.mxu0 %v3066_v45 }
  0x7e   : > { %3632 = vmatpush3.msra.mxu1 %v3022_v44  ;;  %3664 = vmatpush3.msra.mxu0 %v3066_v45  ;;  %v3090_v44 = vld [vmem:[%s4064_s23 + $0x1e4] sm:$0xff]  ;;  %v3055_v45 = vld [vmem:[%s4064_s23 + $0x2f4] sm:$0xff] }
  0x7f   : > { %3575 = vmatprep.mubr.msk.f32.mxu1 %vm394_vm0, %v2952_v46  ;;  %3603 = vmatprep.mubr.msk.f32.mxu0 %vm394_vm0, %v2984_v47  ;;  %v3091_v46 = vld [vmem:[%s4064_s23 + $0x1ec] sm:$0xff]  ;;  %v3056_v47 = vld [vmem:[%s4064_s23 + $0x37c] sm:$0xff] }
  0x80   : > { %3576 = vmatmul.mubr.msk.f32.gmra.mxu1 %vm394_vm0, %v2953_v48  ;;  %3604 = vmatmul.mubr.msk.f32.gmra.mxu0 %vm394_vm0, %v2985_v49  ;;  %v3092_v48 = vld [vmem:[%s4064_s23 + $0x274] sm:$0xff]  ;;  %v3057_v49 = vld [vmem:[%s4064_s23 + $0x384] sm:$0xff] }
  0x81   : > { %3633 = vmatprep.subr.mxu1 %v3021_v50  ;;  %3665 = vmatprep.subr.mxu0 %v3065_v51 }
  0x82   : > { %3634 = vmatpush3.msra.mxu1 %v3021_v50  ;;  %3666 = vmatpush3.msra.mxu0 %v3065_v51  ;;  %v3093_v50 = vld [vmem:[%s4064_s23 + $0x27c] sm:$0xff]  ;;  %v3058_v51 = vld [vmem:[%s4064_s23 + $0x40c] sm:$0xff] }
  0x83   : > { %3578 = vmatprep.mubr.msk.f32.mxu1 %vm394_vm0, %v2954_v52  ;;  %3606 = vmatprep.mubr.msk.f32.mxu0 %vm394_vm0, %v2986_v53  ;;  %v3094_v52 = vld [vmem:[%s4064_s23 + $0x304] sm:$0xff]  ;;  %v3059_v53 = vld [vmem:[%s4064_s23 + $0x414] sm:$0xff] }
  0x84   : > { %3579 = vmatmul.mubr.msk.f32.gmra.mxu1 %vm394_vm0, %v2955_v54  ;;  %3607 = vmatmul.mubr.msk.f32.gmra.mxu0 %vm394_vm0, %v2987_v55  ;;  %v3095_v54 = vld [vmem:[%s4064_s23 + $0x30c] sm:$0xff]  ;;  %v3084_v55 = vld [vmem:[%s4064_s23 + $0x34] sm:$0xff] }
  0x85   : > { %3635 = vmatprep.subr.mxu1 %v3020_v56  ;;  %3667 = vmatprep.subr.mxu0 %v3064_v57 }
  0x86   : > { %3636 = vmatpush3.msra.mxu1 %v3020_v56  ;;  %3668 = vmatpush3.msra.mxu0 %v3064_v57  ;;  %v3096_v56 = vld [vmem:[%s4064_s23 + $0x394] sm:$0xff]  ;;  %v3085_v57 = vld [vmem:[%s4064_s23 + $0x3c] sm:$0xff] }
  0x87   : > { %3609 = vmatprep.mubr.msk.f32.mxu0 %vm394_vm0, %v2988_v58  ;;  %3637 = vmatprep.mubr.msk.f32.mxu1 %vm394_vm0, %v1909_v59  ;;  %v3097_v58 = vld [vmem:[%s4064_s23 + $0x39c] sm:$0xff]  ;;  %v3086_v59 = vld [vmem:[%s4064_s23 + $0xc4] sm:$0xff] }
  0x88   : > { %3610 = vmatmul.mubr.msk.f32.gmra.mxu0 %vm394_vm0, %v2989_v60  ;;  %3638 = vmatmul.mubr.msk.f32.vlgmr.msra.gmra.mxu1 %vm394_vm0, %v1910_v61  ;;  %v3098_v60 = vld [vmem:[%s4064_s23 + $0x424] sm:$0xff]  ;;  %v3087_v61 = vld [vmem:[%s4064_s23 + $0xcc] sm:$0xff] }
  0x89   : > { %3669 = vmatprep.subr.mxu0 %v3063_v62  ;;  %3741 = vmatprep.subr.mxu1 %v4421_v63 }
  0x8a   : > { %3670 = vmatpush3.msra.mxu0 %v3063_v62  ;;  %3749 = vmatpush3.msra.mxu1 %v4421_v63  ;;  %v3099_v62 = vld [vmem:[%s4064_s23 + $0x42c] sm:$0xff]  ;;  %s4587_s23 = scalar_lea.vmem [#allocation2], %s2793_s13 }
  0x8b   : > { %3612 = vmatprep.mubr.msk.f32.mxu0 %vm394_vm0, %v2990_v0  ;;  %3640 = vmatprep.mubr.msk.f32.mxu1 %vm394_vm0, %v1911_v1  ;;  %s2669_s15 = sshll.u32 %s4587_s23, 4  ;;  %s4607_s15 = int_to_ptr.vmem [resolvable:$true] %s2669_s15 }
  0x8c   : > { %3613 = vmatmul.mubr.msk.f32.gmra.mxu0 %vm394_vm0, %v2991_v2  ;;  %3641 = vmatmul.mubr.msk.f32.gmra.mxu1 %vm394_vm0, %v1912_v3  ;;  %s3809_s22 = scalar_lea.vmem %s4607_s15, 128  ;;  %p3816_p0 = scmp.lt.s32.totalorder %s4607_s15, %s3814_s8 }
  0x8d   : > { %3671 = vmatprep.subr.mxu0 %v3062_v4  ;;  %3742 = vmatprep.subr.mxu1 %v4439_v5  ;;  %p3810_p11 = scmp.ne.s32.totalorder %s4607_s15, %s3809_s22  ;;  %p3817_p1 = scmp.lt.s32.totalorder %s3815_s9, %s3809_s22 }
  0x8e   : > { %3672 = vmatpush3.msra.mxu0 %v3062_v4  ;;  %3750 = vmatpush3.msra.mxu1 %v4439_v5 }
  0x8f   : > { %3615 = vmatprep.mubr.msk.f32.mxu0 %vm394_vm0, %v2992_v6  ;;  %3643 = vmatprep.mubr.msk.f32.mxu1 %vm394_vm0, %v1913_v7  ;;  %p3811_p12 = pnand %p3810_p11, %p3988_p5  ;;  %p3818_p2 = por %p3817_p1, %p3816_p0 }
  0x90   : > { %3616 = vmatmul.mubr.msk.f32.gmra.mxu0 %vm394_vm0, %v2993_v8  ;;  %3644 = vmatmul.mubr.msk.f32.gmra.mxu1 %vm394_vm0, %v1914_v9 }
  0x91   : > { %3673 = vmatprep.subr.mxu0 %v3061_v10  ;;  %3743 = vmatprep.subr.mxu1 %v4457_v11  ;;  %p3812_p13 = pneg %p3811_p12 }
  0x92   : > { %3674 = vmatpush3.msra.mxu0 %v3061_v10  ;;  %3751 = vmatpush3.msra.mxu1 %v4457_v11 }
  0x93   : > { %3618 = vmatprep.mubr.msk.f32.mxu0 %vm394_vm0, %v2994_v12  ;;  %3646 = vmatprep.mubr.msk.f32.mxu1 %vm394_vm0, %v1915_v13  ;;  %p3819_p3 = pnand %p3818_p2, %p3812_p13 }
  0x94   : > { %3619 = vmatmul.mubr.msk.f32.gmra.mxu0 %vm394_vm0, %v2995_v14  ;;  %3647 = vmatmul.mubr.msk.f32.gmra.mxu1 %vm394_vm0, %v1916_v15 }
  0x95   : > { %3675 = vmatprep.subr.mxu0 %v3060_v16  ;;  %3744 = vmatprep.subr.mxu1 %v3104_v17 }
  0x96   : > { %3676 = vmatpush3.msra.mxu0 %v3060_v16  ;;  %3752 = vmatpush3.msra.mxu1 %v3104_v17 }
  0x97   : > { %3649 = vmatprep.mubr.msk.f32.mxu1 %vm394_vm0, %v1917_v18  ;;  %3677 = vmatprep.mubr.msk.f32.mxu0 %vm394_vm0, %v3044_v19 }
  0x98   : > { %3650 = vmatmul.mubr.msk.f32.gmra.mxu1 %vm394_vm0, %v1918_v20  ;;  %3678 = vmatmul.mubr.msk.f32.vlgmr.msra.gmra.mxu0 %vm394_vm0, %v3045_v21 }
  0x99   : > { %3701 = vmatprep.subr.mxu0 %v4421_v63  ;;  %3745 = vmatprep.subr.mxu1 %v3103_v22 }
  0x9a   : > { %3702 = vmatpush3.msra.mxu0 %v4421_v63  ;;  %3753 = vmatpush3.msra.mxu1 %v3103_v22  ;;  %v2798_v63 = vld [vmem:[%s4914_s5] ss:$0 sm:$0xff] }
  0x9b   : > { %3652 = vmatprep.mubr.msk.f32.mxu1 %vm394_vm0, %v1919_v24  ;;  %3680 = vmatprep.mubr.msk.f32.mxu0 %vm394_vm0, %v3046_v25 }
  0x9c   : > { %3653 = vmatmul.mubr.msk.f32.gmra.mxu1 %vm394_vm0, %v1920_v26  ;;  %3681 = vmatmul.mubr.msk.f32.gmra.mxu0 %vm394_vm0, %v3047_v27 }
  0x9d   : > { %3703 = vmatprep.subr.mxu0 %v4439_v5  ;;  %3746 = vmatprep.subr.mxu1 %v3102_v28 }
  0x9e   : > { %3704 = vmatpush3.msra.mxu0 %v4439_v5  ;;  %3754 = vmatpush3.msra.mxu1 %v3102_v28 }
  0x9f   : > { %3655 = vmatprep.mubr.msk.f32.mxu1 %vm394_vm0, %v1921_v29  ;;  %3683 = vmatprep.mubr.msk.f32.mxu0 %vm394_vm0, %v3048_v30 }
  0xa0   : > { %3656 = vmatmul.mubr.msk.f32.gmra.mxu1 %vm394_vm0, %v1922_v31  ;;  %3684 = vmatmul.mubr.msk.f32.gmra.mxu0 %vm394_vm0, %v3049_v32 }
  0xa1   : > { %3705 = vmatprep.subr.mxu0 %v4457_v11  ;;  %3747 = vmatprep.subr.mxu1 %v3101_v33 }
  0xa2   : > { %3706 = vmatpush3.msra.mxu0 %v4457_v11  ;;  %3755 = vmatpush3.msra.mxu1 %v3101_v33 }
  0xa3   : > { %3658 = vmatprep.mubr.msk.f32.mxu1 %vm394_vm0, %v1923_v34  ;;  %3686 = vmatprep.mubr.msk.f32.mxu0 %vm394_vm0, %v3050_v35 }
  0xa4   : > { %3659 = vmatmul.mubr.msk.f32.gmra.mxu1 %vm394_vm0, %v1924_v36  ;;  %3687 = vmatmul.mubr.msk.f32.gmra.mxu0 %vm394_vm0, %v3051_v37 }
  0xa5   : > { %3707 = vmatprep.subr.mxu0 %v3104_v17  ;;  %3748 = vmatprep.subr.mxu1 %v3100_v38 }
  0xa6   : > { %3708 = vmatpush3.msra.mxu0 %v3104_v17  ;;  %3756 = vmatpush3.msra.mxu1 %v3100_v38 }
  0xa7   : > { %3689 = vmatprep.mubr.msk.f32.mxu0 %vm394_vm0, %v3052_v39  ;;  %3723 = vmatprep.mubr.msk.f32.mxu1 %vm394_vm0, %v3088_v40 }
  0xa8   : > { %3690 = vmatmul.mubr.msk.f32.gmra.mxu0 %vm394_vm0, %v3053_v41  ;;  %3709 = vmatprep.subr.mxu0 %v3103_v22 }
  0xa9   : > { %3724 = vmatmul.mubr.msk.f32.vlgmr.msra.gmra.mxu1 %vm394_vm0, %v3089_v42  ;;  %3710 = vmatpush3.msra.mxu0 %v3103_v22 }
  0xaa   : > { %3692 = vmatprep.mubr.msk.f32.mxu0 %vm394_vm0, %v3054_v43  ;;  %3726 = vmatprep.mubr.msk.f32.mxu1 %vm394_vm0, %v3090_v44 }
  0xab   : > { %3711 = vmatprep.subr.mxu0 %v3102_v28 }
  0xac   : > { %3693 = vmatmul.mubr.msk.f32.gmra.mxu0 %vm394_vm0, %v3055_v45 }
  0xad   : > { %3727 = vmatmul.mubr.msk.f32.gmra.mxu1 %vm394_vm0, %v3091_v46  ;;  %3712 = vmatpush3.msra.mxu0 %v3102_v28 }
  0xae   : > { %3695 = vmatprep.mubr.msk.f32.mxu0 %vm394_vm0, %v3056_v47  ;;  %3729 = vmatprep.mubr.msk.f32.mxu1 %vm394_vm0, %v3092_v48 }
  0xaf   : > { %3713 = vmatprep.subr.mxu0 %v3101_v33 }
  0xb0   : > { %3696 = vmatmul.mubr.msk.f32.gmra.mxu0 %vm394_vm0, %v3057_v49 }
  0xb1   : > { %3730 = vmatmul.mubr.msk.f32.gmra.mxu1 %vm394_vm0, %v3093_v50  ;;  %3714 = vmatpush3.msra.mxu0 %v3101_v33 }
  0xb2   : > { %3698 = vmatprep.mubr.msk.f32.mxu0 %vm394_vm0, %v3058_v51  ;;  %3732 = vmatprep.mubr.msk.f32.mxu1 %vm394_vm0, %v3094_v52 }
  0xb3   : > { %3715 = vmatprep.subr.mxu0 %v3100_v38 }
  0xb4   : > { %3699 = vmatmul.mubr.msk.f32.gmra.mxu0 %vm394_vm0, %v3059_v53 }
  0xb5   : > { %3733 = vmatmul.mubr.msk.f32.gmra.mxu1 %vm394_vm0, %v3095_v54  ;;  %3716 = vmatpush3.msra.mxu0 %v3100_v38 }
  0xb6   : > { %3717 = vmatprep.mubr.msk.f32.mxu0 %vm394_vm0, %v3084_v55  ;;  %3735 = vmatprep.mubr.msk.f32.mxu1 %vm394_vm0, %v3096_v56 }
  0xb8   : > { %3718 = vmatmul.mubr.msk.f32.vlgmr.msra.gmra.mxu0 %vm394_vm0, %v3085_v57 }
  0xb9   : > { %3736 = vmatmul.mubr.msk.f32.gmra.mxu1 %vm394_vm0, %v3097_v58  ;;  %3720 = vmatprep.mubr.msk.f32.mxu0 %vm394_vm0, %v3086_v59 }
  0xba   : > { %3738 = vmatprep.mubr.msk.f32.mxu1 %vm394_vm0, %v3098_v60 }
  0xbc   : > { %3721 = vmatmul.mubr.msk.f32.gmra.mxu0 %vm394_vm0, %v3087_v61 }
  0xbd   : > { %3739 = vmatmul.mubr.msk.f32.gmra.mxu1 %vm394_vm0, %v3099_v62 }
  0xe7   : > { %v3399_v0 = vpop.f32.mrf.mxu1 }
  0xe8   : > { %v463_v1 = vpop.f32.mrf.mxu0 }
  0xe9   : > { %v464_v2 = vadd.f32 %v2798_v63, %v463_v1  ;;  %v697_v3 = vpop.f32.mrf.mxu1 }
  0xea   : > { %v3380_v4 = vpop.f32.mrf.mxu0 }
  0xeb   : > { %v468_v5 = vcombine.high %v464_v2, %v464_v2  ;;  %v475_v6 = vrot.slane %v464_v2, %v4040_v23  ;;  %v3402_v7 = vpop.f32.mrf.mxu1 }
  0xed   : > { %v482_v8 = vrot.slane %v468_v5, %v4040_v23  ;;  %v483_v9 = vcombine.high %v475_v6, %v475_v6  ;;  %v491_v10 = vrot.slane %v475_v6, %v4040_v23  ;;  %2800 = vst.sshfl [vmem:[%s4587_s23] sm:$0x1 pattern:$0x73625140] %v475_v6  ;;  %v707_v11 = vpop.f32.mrf.mxu1 }
  0xef   : > { %v484_v12 = vcombine.high %v482_v8, %v482_v8  ;;  %v498_v13 = vrot.slane %v482_v8, %v4040_v23  ;;  %v505_v14 = vrot.slane %v483_v9, %v4040_v23  ;;  %v513_v15 = vcombine.high %v491_v10, %v491_v10  ;;  %2801 = vst.sshfl [vmem:[%s4587_s23 + $0x1] sm:$0x1 pattern:$0x73625140] %v483_v9  ;;  %v3405_v16 = vpop.f32.mrf.mxu1 }
  0xf0   : > { %2802 = vst.sshfl [vmem:[%s4587_s23 + $0x4] sm:$0x1 pattern:$0x73625140] %v482_v8 }
  0xf1   : > { %v512_v17 = vrot.slane %v484_v12, %v4040_v23  ;;  %v514_v18 = vcombine.high %v498_v13, %v498_v13  ;;  %v515_v19 = vcombine.high %v505_v14, %v505_v14  ;;  %527 = vst [vmem:[%s4587_s23 + $0x2] sm:$0x1] %v513_v15  ;;  %2803 = vst.sshfl [vmem:[%s4587_s23 + $0x5] sm:$0x1 pattern:$0x73625140] %v484_v12  ;;  %v717_v20 = vpop.f32.mrf.mxu1 }
  0xf3   : > { %v516_v21 = vcombine.high %v512_v17, %v512_v17  ;;  %528 = vst [vmem:[%s4587_s23 + $0x3] sm:$0x1] %v515_v19  ;;  %531 = vst [vmem:[%s4587_s23 + $0x6] sm:$0x1] %v514_v18  ;;  %v3408_v22 = vpop.f32.mrf.mxu1 }
  0xf5   : > { %532 = vst [vmem:[%s4587_s23 + $0x7] sm:$0x1] %v516_v21  ;;  %v727_v24 = vpop.f32.mrf.mxu1 }
  0xf8   : > { %v3411_v25 = vpop.f32.mrf.mxu1  ;;  %v3439_v26 = vpop.f32.mrf.mxu0 }
  0xf9   : > { %v896_v27 = vadd.f32 %v3439_v26, %v3399_v0 }
  0xfa   : > { %v737_v28 = vpop.f32.mrf.mxu1  ;;  %v890_v29 = vpop.f32.mrf.mxu0 }
  0xfb   : > { %v891_v30 = vadd.f32 %v890_v29, %v697_v3 }
  0xfc   : > { %v3414_v23 = vpop.f32.mrf.mxu1  ;;  %v3442_v31 = vpop.f32.mrf.mxu0 }
  0xfd   : > { %v906_v32 = vadd.f32 %v3442_v31, %v3402_v7 }
  0xfe   : > { %v747_v33 = vpop.f32.mrf.mxu1  ;;  %v900_v34 = vpop.f32.mrf.mxu0 }
  0xff   : > { %v901_v35 = vadd.f32 %v900_v34, %v707_v11 }
 0x100   : > { %v3417_v36 = vpop.f32.mrf.mxu1  ;;  %v3445_v37 = vpop.f32.mrf.mxu0 }
 0x101   : > { %v916_v38 = vadd.f32 %v3445_v37, %v3405_v16 }
 0x102   : > { %v757_v39 = vpop.f32.mrf.mxu1  ;;  %v910_v40 = vpop.f32.mrf.mxu0 }
 0x103   : > { %v911_v41 = vadd.f32 %v910_v40, %v717_v20 }
 0x104   : > { %v3420_v42 = vpop.f32.mrf.mxu1  ;;  %v3448_v43 = vpop.f32.mrf.mxu0 }
 0x105   : > { %v926_v44 = vadd.f32 %v3448_v43, %v3408_v22 }
 0x106   : > { %v767_v45 = vpop.f32.mrf.mxu1  ;;  %v920_v46 = vpop.f32.mrf.mxu0 }
 0x107   : > { %3822 = shalt.err (!%p3819_p3)
}
 0x108   : > { %s3823_s21 = scalar_lea.hbm %s4605_s18, 128  ;;  %s3827_s14 = scalar_lea.hbm %s4915_s6, 512 }
 0x109   : > { %p3824_p4 = scmp.ne.s32.totalorder %s4605_s18, %s3823_s21  ;;  %p3828_p9 = scmp.lt.s32.totalorder %s4605_s18, %s4915_s6 }
 0x10a   : > { %p3829_p10 = scmp.lt.s32.totalorder %s3827_s14, %s3823_s21 }
 0x10b   : > { %p3825_p7 = pnand %p3824_p4, %p3988_p5 }
 0x10c   : > { %p3830_p11 = por %p3829_p10, %p3828_p9 }
 0x10d   : > { %p3826_p8 = pneg %p3825_p7 }
 0x10f   : > { %p3831_p12 = pnand %p3830_p11, %p3826_p8 }
 0x111   : > { %3834 = shalt.err (!%p3831_p12)
}
 0x112   : > { %s3905_s22 = smov 16   ;;  %s3906_s29 = smov 1   ;;  %v921_v47 = vadd.f32 %v920_v46, %v727_v24  ;;  %v3451_v48 = vpop.f32.mrf.mxu0  ;;  %v3479_v49 = vpop.f32.mrf.mxu1 }
 0x113   : > { %3758 = dma.vmem_to_hbm [thread:$0]  (%p3988_p5), %s4607_s15, 128, %s4605_s18, %s2651_s20, %s3905_s22, %s3905_s22, %s3906_s29   ;;  %v936_v50 = vadd.f32 %v3451_v48, %v3411_v25  ;;  %v1189_v51 = vadd.f32 %v3479_v49, %v896_v27 }
 0x114   : > { %v930_v52 = vpop.f32.mrf.mxu0  ;;  %v1109_v53 = vpop.f32.mrf.mxu1  ;;  %s2794_s15 = sshll.u32 %s4578_s19, 7  ;;  %s3136_s9 = sshll.u32 %s3971_s28, 11 }
 0x115   : > { %v931_v54 = vadd.f32 %v930_v52, %v737_v28  ;;  %v1188_v55 = vadd.f32 %v1109_v53, %v891_v30  ;;  %s4787_s8 = scalar_lea.vmem [#allocation4], %s2794_s15  ;;  %s4861_s28 = scalar_lea.hbm %s4916_s7, %s3136_s9 }
 0x116   : > { %v3454_v56 = vpop.f32.mrf.mxu0  ;;  %v3482_v57 = vpop.f32.mrf.mxu1  ;;  %s2686_s21 = sshll.u32 %s4787_s8, 4  ;;  %s2656_s14 = scalar_lea.sflag [#allocation5], %s4578_s19  ;;  %s4863_s21 = int_to_ptr.vmem [resolvable:$true] %s2686_s21 }
 0x117   : > { %v946_v58 = vadd.f32 %v3454_v56, %v3414_v23  ;;  %v1191_v59 = vadd.f32 %v3482_v57, %v906_v32  ;;  %s3835_s16 = scalar_lea.vmem %s4863_s21, 2048  ;;  %s3907_s17 = smov [#allocation4]  }
 0x118   : > { %v940_v60 = vpop.f32.mrf.mxu0  ;;  %v1119_v61 = vpop.f32.mrf.mxu1  ;;  %p3836_p13 = scmp.ne.s32.totalorder %s4863_s21, %s3835_s16  ;;  %s3839_s22 = sshll.u32 %s3907_s17, 4  ;;  %s3840_s22 = int_to_ptr.vmem [resolvable:$false] %s3839_s22 }
 0x119   : > { %v941_v62 = vadd.f32 %v940_v60, %v747_v33  ;;  %v1190_v63 = vadd.f32 %v1119_v61, %v901_v35  ;;  %s3841_s29 = scalar_lea.vmem %s3840_s22, 4096  ;;  %p3842_p2 = scmp.lt.s32.totalorder %s4863_s21, %s3840_s22 }
 0x11a   : > { %v3457_v0 = vpop.f32.mrf.mxu0  ;;  %v3485_v1 = vpop.f32.mrf.mxu1  ;;  %p3837_p0 = pnand %p3836_p13, %p3988_p5  ;;  %p3843_p3 = scmp.lt.s32.totalorder %s3841_s29, %s3835_s16 }
 0x11b   : > { %v956_v2 = vadd.f32 %v3457_v0, %v3417_v36  ;;  %v4632_v3 = vadd.f32 %v3485_v1, %v916_v38 }
 0x11c   : > { %v950_v4 = vpop.f32.mrf.mxu0  ;;  %v1129_v5 = vpop.f32.mrf.mxu1  ;;  %p3838_p1 = pneg %p3837_p0  ;;  %p3844_p4 = por %p3843_p3, %p3842_p2 }
 0x11d   : > { %v951_v6 = vadd.f32 %v950_v4, %v757_v39  ;;  %v4634_v7 = vadd.f32 %v1129_v5, %v911_v41 }
 0x11e   : > { %v3460_v8 = vpop.f32.mrf.mxu0  ;;  %v3488_v9 = vpop.f32.mrf.mxu1  ;;  %p3845_p7 = pnand %p3844_p4, %p3838_p1 }
 0x11f   : > { %v966_v10 = vadd.f32 %v3460_v8, %v3420_v42  ;;  %v4636_v11 = vadd.f32 %v3488_v9, %v926_v44 }
 0x120   : > { %v960_v12 = vpop.f32.mrf.mxu0  ;;  %v1139_v13 = vpop.f32.mrf.mxu1 }
 0x121   : > { %v961_v14 = vadd.f32 %v960_v12, %v767_v45  ;;  %v4638_v15 = vadd.f32 %v1139_v13, %v921_v47 }
 0x122   : > { %v3491_v16 = vpop.f32.mrf.mxu1  ;;  %v3519_v17 = vpop.f32.mrf.mxu0 }
 0x123   : > { %v4640_v18 = vadd.f32 %v3491_v16, %v936_v50  ;;  %v1424_v19 = vadd.f32 %v3519_v17, %v1189_v51 }
 0x124   : > { %v1149_v20 = vpop.f32.mrf.mxu1  ;;  %v1344_v21 = vpop.f32.mrf.mxu0 }
 0x125   : > { %v4642_v22 = vadd.f32 %v1149_v20, %v931_v54  ;;  %v1423_v24 = vadd.f32 %v1344_v21, %v1188_v55 }
 0x126   : > { %v3494_v25 = vpop.f32.mrf.mxu1  ;;  %v3522_v26 = vpop.f32.mrf.mxu0 }
 0x127   : > { %v4644_v27 = vadd.f32 %v3494_v25, %v946_v58  ;;  %v1426_v28 = vadd.f32 %v3522_v26, %v1191_v59 }
 0x128   : > { %v1159_v29 = vpop.f32.mrf.mxu1  ;;  %v1354_v30 = vpop.f32.mrf.mxu0 }
 0x129   : > { %v4646_v23 = vadd.f32 %v1159_v29, %v941_v62  ;;  %v1425_v31 = vadd.f32 %v1354_v30, %v1190_v63 }
 0x12a   : > { %v3497_v32 = vpop.f32.mrf.mxu1  ;;  %v4648_v33 = vpop.f32.mrf.mxu0 }
 0x12b   : > { %v4650_v34 = vadd.f32 %v3497_v32, %v956_v2 }
 0x12c   : > { %v1169_v35 = vpop.f32.mrf.mxu1  ;;  %v4652_v36 = vpop.f32.mrf.mxu0 }
 0x12d   : > { %v4654_v37 = vadd.f32 %v1169_v35, %v951_v6 }
 0x12e   : > { %v3500_v38 = vpop.f32.mrf.mxu1  ;;  %v4656_v39 = vpop.f32.mrf.mxu0 }
 0x12f   : > { %v4658_v40 = vadd.f32 %v3500_v38, %v966_v10 }
 0x130   : > { %v1179_v41 = vpop.f32.mrf.mxu1  ;;  %v4660_v42 = vpop.f32.mrf.mxu0 }
 0x131   : > { %v4662_v43 = vadd.f32 %v1179_v41, %v961_v14 }
 0x132   : > { %v4664_v44 = vpop.f32.mrf.mxu0  ;;  %v3559_v45 = vpop.f32.mrf.mxu1 }
 0x133   : > { %v4666_v46 = vadd.f32 %v3559_v45, %v1424_v19 }
 0x134   : > { %v4668_v47 = vpop.f32.mrf.mxu0  ;;  %v1579_v48 = vpop.f32.mrf.mxu1 }
 0x135   : > { %v4670_v49 = vadd.f32 %v1579_v48, %v1423_v24 }
 0x136   : > { %v4672_v50 = vpop.f32.mrf.mxu0  ;;  %v3562_v51 = vpop.f32.mrf.mxu1 }
 0x137   : > { %v4674_v52 = vadd.f32 %v3562_v51, %v1426_v28 }
 0x138   : > { %v4676_v53 = vpop.f32.mrf.mxu0  ;;  %v1589_v54 = vpop.f32.mrf.mxu1 }
 0x139   : > { %4919 = vst [vmem:[#allocation8_spill] sm:$0xff] %v4674_v52  ;;  %v4678_v55 = vadd.f32 %v1589_v54, %v1425_v31 }
 0x13a   : > { %v4680_v56 = vpop.f32.mrf.mxu0  ;;  %v3565_v57 = vpop.f32.mrf.mxu1 }
 0x13b   : > { %4920 = vst [vmem:[#allocation9_spill] sm:$0xff] %v4678_v55 }
 0x13c   : > { %v4682_v58 = vpop.f32.mrf.mxu0  ;;  %v1599_v59 = vpop.f32.mrf.mxu1 }
 0x13e   : > { %v4684_v60 = vpop.f32.mrf.mxu0  ;;  %v3568_v61 = vpop.f32.mrf.mxu1 }
 0x140   : > { %v4686_v62 = vpop.f32.mrf.mxu0  ;;  %v1609_v63 = vpop.f32.mrf.mxu1 }
 0x142   : > { %v4688_v0 = vpop.f32.mrf.mxu1  ;;  %v4690_v1 = vpop.f32.mrf.mxu0 }
 0x144   : > { %v4692_v2 = vpop.f32.mrf.mxu1  ;;  %v4694_v4 = vpop.f32.mrf.mxu0 }
 0x145   : > { %4921 = vst [vmem:[#allocation10_spill] sm:$0xff] %v4694_v4 }
 0x146   : > { %v4696_v5 = vpop.f32.mrf.mxu1  ;;  %v4698_v6 = vpop.f32.mrf.mxu0 }
 0x147   : > { %4922 = vst [vmem:[#allocation11_spill] sm:$0xff] %v4698_v6 }
 0x148   : > { %v4700_v8 = vpop.f32.mrf.mxu1  ;;  %v4702_v9 = vpop.f32.mrf.mxu0 }
 0x149   : > { %4923 = vst [vmem:[#allocation12_spill] sm:$0xff] %v4702_v9 }
 0x14a   : > { %v4704_v10 = vpop.f32.mrf.mxu1  ;;  %v3605_v12 = vpop.f32.mrf.mxu0 }
 0x14c   : > { %v4706_v13 = vpop.f32.mrf.mxu1  ;;  %v1834_v14 = vpop.f32.mrf.mxu0 }
 0x14d   : > { %4924 = vst [vmem:[#allocation13_spill] sm:$0xff] %v4706_v13 }
 0x14e   : > { %v4708_v16 = vpop.f32.mrf.mxu1  ;;  %v3608_v17 = vpop.f32.mrf.mxu0 }
 0x14f   : > { %4925 = vst [vmem:[#allocation14_spill] sm:$0xff] %v4708_v16 }
 0x150   : > { %v4710_v19 = vpop.f32.mrf.mxu1  ;;  %v1844_v20 = vpop.f32.mrf.mxu0 }
 0x151   : > { %4926 = vst [vmem:[#allocation15_spill] sm:$0xff] %v4710_v19 }
 0x152   : > { %v3611_v21 = vpop.f32.mrf.mxu0  ;;  %v4712_v24 = vpop.f32.mrf.mxu1 }
 0x153   : > { %4927 = vst [vmem:[#allocation16_spill] sm:$0xff] %v4712_v24 }
 0x154   : > { %v4714_v25 = vpop.f32.mrf.mxu0  ;;  %v4716_v26 = vpop.f32.mrf.mxu1 }
 0x155   : > { %4928 = vst [vmem:[#allocation17_spill] sm:$0xff] %v4716_v26 }
 0x156   : > { %v4718_v28 = vpop.f32.mrf.mxu0  ;;  %v4720_v29 = vpop.f32.mrf.mxu1 }
 0x157   : > { %4929 = vst [vmem:[#allocation18_spill] sm:$0xff] %v4720_v29 }
 0x158   : > { %v4722_v30 = vpop.f32.mrf.mxu0  ;;  %v4724_v31 = vpop.f32.mrf.mxu1 }
 0x159   : > { %4930 = vst [vmem:[#allocation19_spill] sm:$0xff] %v4724_v31 }
 0x15a   : > { %v4726_v32 = vpop.f32.mrf.mxu0  ;;  %v3645_v35 = vpop.f32.mrf.mxu1 }
 0x15b   : > { %4931 = vst [vmem:[#allocation20_spill] sm:$0xff] %v4726_v32 }
 0x15c   : > { %v4728_v38 = vpop.f32.mrf.mxu0  ;;  %v2068_v41 = vpop.f32.mrf.mxu1 }
 0x15d   : > { %4932 = vst [vmem:[#allocation21_spill] sm:$0xff] %v4728_v38 }
 0x15e   : > { %v4730_v45 = vpop.f32.mrf.mxu0  ;;  %v3648_v48 = vpop.f32.mrf.mxu1 }
 0x15f   : > { %4933 = vst [vmem:[#allocation22_spill] sm:$0xff] %v4730_v45  ;;  %v1428_v45 = vadd.f32 %v4648_v33, %v4632_v3  ;;  %v1429_v3 = vadd.f32 %v4660_v42, %v4638_v15 }
 0x160   : > { %v4732_v51 = vpop.f32.mrf.mxu0  ;;  %v2078_v54 = vpop.f32.mrf.mxu1 }
 0x161   : > { %4934 = vst [vmem:[#allocation23_spill] sm:$0xff] %v4732_v51  ;;  %v1663_v32 = vadd.f32 %v3565_v57, %v1428_v45  ;;  %v1432_v57 = vadd.f32 %v4664_v44, %v4640_v18  ;;  %v1664_v45 = vadd.f32 %v1609_v63, %v1429_v3 }
 0x162   : > { %v3651_v26 = vpop.f32.mrf.mxu1  ;;  %v4734_v19 = vpop.f32.mrf.mxu0 }
 0x163   : > { %4935 = vst [vmem:[#allocation24_spill] sm:$0xff] %v4734_v19  ;;  %v1427_v19 = vadd.f32 %v4652_v36, %v4634_v7  ;;  %v1898_v6 = vadd.f32 %v3605_v12, %v1663_v32  ;;  %v1667_v15 = vadd.f32 %v4688_v0, %v1432_v57 }
 0x164   : > { %v4736_v29 = vpop.f32.mrf.mxu1  ;;  %v4738_v24 = vpop.f32.mrf.mxu0 }
 0x165   : > { %4936 = vst [vmem:[#allocation25_spill] sm:$0xff] %v4738_v24  ;;  %v2132_v4 = vadd.f32 %v3645_v35, %v1898_v6  ;;  %v1899_v6 = vadd.f32 %v1844_v20, %v1664_v45  ;;  %v1433_v20 = vadd.f32 %v4676_v53, %v4646_v23  ;;  %v1438_v53 = vadd.f32 %v4684_v60, %v4658_v40  ;;  %v4941_v45 = vld [vmem:[#allocation10_spill] sm:$0xff] }
 0x166   : > { %v4740_v31 = vpop.f32.mrf.mxu1  ;;  %v4742_v16 = vpop.f32.mrf.mxu0  ;;  %v1894_v40 = vadd.f32 %v4690_v1, %v4666_v46  ;;  %v4944_v1 = vld [vmem:[#allocation13_spill] sm:$0xff] }
 0x167   : > { %4937 = vst [vmem:[#allocation26_spill] sm:$0xff] %v4742_v16  ;;  %v1430_v16 = vadd.f32 %v4656_v39, %v4636_v11  ;;  %v2133_v0 = vadd.f32 %v2078_v54, %v1899_v6 }
 0x168   : > { %v4744_v9 = vpop.f32.mrf.mxu1  ;;  %v4746_v38 = vpop.f32.mrf.mxu0 }
 0x169   : > { %4938 = vst [vmem:[#allocation27_spill] sm:$0xff] %v4744_v9  ;;  %4939 = vst [vmem:[#allocation28_spill] sm:$0xff] %v4746_v38  ;;  %v1662_v9 = vadd.f32 %v1599_v59, %v1427_v19  ;;  %v1665_v33 = vadd.f32 %v3568_v61, %v1430_v16  ;;  %v1431_v19 = vadd.f32 %v4668_v47, %v4642_v22  ;;  %v4773_v61 = vld [vmem:[%s4912_s3] ss:$0 sm:$0xff] }
 0x16a   : > { %v4750_v51 = vpop.f32.mrf.mxu1  ;;  %v3685_v55 = vpop.f32.mrf.mxu0  ;;  %v1902_v22 = vadd.f32 %v3611_v21, %v1667_v15 }
 0x16b   : > { %4940 = vst [vmem:[#allocation29_spill] sm:$0xff] %v4750_v51  ;;  %v1897_v51 = vadd.f32 %v1834_v14, %v1662_v9  ;;  %v1900_v11 = vadd.f32 %v3608_v17, %v1665_v33  ;;  %v2366_v59 = vadd.f32 %v3685_v55, %v2132_v4  ;;  %v1434_v55 = vadd.f32 %v4672_v50, %v4644_v27 }
 0x16c   : > { %v4754_v24 = vpop.f32.mrf.mxu1  ;;  %v2302_v13 = vpop.f32.mrf.mxu0  ;;  %v1666_v4 = vadd.f32 %v4692_v2, %v1431_v19  ;;  %v2136_v2 = vadd.f32 %v3651_v26, %v1902_v22  ;;  %v4951_v22 = vld [vmem:[#allocation21_spill] sm:$0xff] }
 0x16d   : > { %v2131_v39 = vadd.f32 %v2068_v41, %v1897_v51  ;;  %v2134_v9 = vadd.f32 %v3648_v48, %v1900_v11  ;;  %v1669_v35 = vadd.f32 %v4696_v5, %v1434_v55  ;;  %v4943_v11 = vld [vmem:[#allocation11_spill] sm:$0xff]  ;;  %v4950_v55 = vld [vmem:[#allocation16_spill] sm:$0xff] }
 0x16e   : > { %v4758_v38 = vpop.f32.mrf.mxu1  ;;  %v3688_v52 = vpop.f32.mrf.mxu0  ;;  %v1901_v27 = vadd.f32 %v4714_v25, %v1666_v4  ;;  %v2128_v4 = vadd.f32 %v4950_v55, %v1894_v40  ;;  %v4959_v40 = vld [vmem:[#allocation25_spill] sm:$0xff] }
 0x16f   : > { %v2365_v18 = vadd.f32 %v2302_v13, %v2131_v39  ;;  %v2368_v14 = vadd.f32 %v3688_v52, %v2134_v9  ;;  %v1436_v13 = vadd.f32 %v4680_v56, %v4650_v34  ;;  %v1435_v34 = vadd.f32 %v4682_v58, %v4654_v37  ;;  %v4945_v39 = vld [vmem:[#allocation20_spill] sm:$0xff]  ;;  %v4947_v9 = vld [vmem:[#allocation9_spill] sm:$0xff] }
 0x170   : > { %v4762_v7 = vpop.f32.mrf.mxu1  ;;  %v2312_v36 = vpop.f32.mrf.mxu0  ;;  %v1668_v56 = vadd.f32 %v4700_v8, %v1433_v20  ;;  %v1904_v5 = vadd.f32 %v4718_v28, %v1669_v35  ;;  %v2135_v26 = vadd.f32 %v4736_v29, %v1901_v27  ;;  %v1437_v37 = vadd.f32 %v4686_v62, %v4662_v43  ;;  %v4942_v62 = vld [vmem:[#allocation8_spill] sm:$0xff]  ;;  %v4953_v35 = vld [vmem:[#allocation15_spill] sm:$0xff] }
 0x171   : > { %v2367_v21 = vadd.f32 %v2312_v36, %v2133_v0  ;;  %v1671_v58 = vadd.f32 %v4704_v10, %v1436_v13  ;;  %v1893_v43 = vadd.f32 %v4941_v45, %v4670_v49  ;;  %v1896_v46 = vadd.f32 %v4943_v11, %v4942_v62 }
 0x172   : > { %v3691_v12 = vpop.f32.mrf.mxu0  ;;  %v3725_v42 = vpop.f32.mrf.mxu1  ;;  %v1903_v60 = vadd.f32 %v4722_v30, %v1668_v56  ;;  %v2138_v28 = vadd.f32 %v4740_v31, %v1904_v5  ;;  %v1670_v10 = vadd.f32 %v4944_v1, %v1435_v34  ;;  %v1672_v27 = vadd.f32 %v4953_v35, %v1437_v37 }
 0x173   : > { %v2600_v44 = vadd.f32 %v3725_v42, %v2366_v59  ;;  %v2370_v48 = vadd.f32 %v3691_v12, %v2136_v2  ;;  %v1906_v30 = vadd.f32 %v4945_v39, %v1671_v58  ;;  %v4946_v12 = vld [vmem:[#allocation27_spill] sm:$0xff] }
 0x174   : > { %v2322_v63 = vpop.f32.mrf.mxu0  ;;  %v2536_v47 = vpop.f32.mrf.mxu1  ;;  %v2137_v31 = vadd.f32 %v4946_v12, %v1903_v60 }
 0x175   : > { %v2623_v16 = vadd.f32 %v4773_v61, %v2600_v44  ;;  %v2599_v17 = vadd.f32 %v2536_v47, %v2365_v18  ;;  %v2369_v29 = vadd.f32 %v2322_v63, %v2135_v26  ;;  %v4948_v18 = vld [vmem:[#allocation12_spill] sm:$0xff]  ;;  %v4949_v44 = vld [vmem:[#allocation14_spill] sm:$0xff]  ;;  %v1905_v47 = vadd.f32 %v4951_v22, %v1670_v10 }
 0x176   : > { %v3694_v32 = vpop.f32.mrf.mxu0  ;;  %v3728_v50 = vpop.f32.mrf.mxu1  ;;  %v1895_v49 = vadd.f32 %v4948_v18, %v4947_v9  ;;  %v1673_v63 = vadd.f32 %v4949_v44, %v1438_v53 }
 0x177   : > { %2639 = vst [vmem:[%s4787_s8 + $0x28] sm:$0xff] %v2623_v16  ;;  %v2622_v52 = vadd.f32 %v4773_v61, %v2599_v17  ;;  %v2602_v41 = vadd.f32 %v3728_v50, %v2368_v14  ;;  %v2372_v19 = vadd.f32 %v3694_v32, %v2138_v28  ;;  %v4952_v14 = vld [vmem:[#allocation29_spill] sm:$0xff]  ;;  %v2139_v56 = vadd.f32 %v4754_v24, %v1905_v47 }
 0x178   : > { %v2332_v23 = vpop.f32.mrf.mxu0  ;;  %v2546_v25 = vpop.f32.mrf.mxu1  ;;  %v2140_v16 = vadd.f32 %v4952_v14, %v1906_v30  ;;  %v4954_v50 = vld [vmem:[#allocation17_spill] sm:$0xff] }
 0x179   : > { %2638 = vst [vmem:[%s4787_s8 + $0x20] sm:$0xff] %v2622_v52  ;;  %v2625_v51 = vadd.f32 %v4773_v61, %v2602_v41  ;;  %v2601_v54 = vadd.f32 %v2546_v25, %v2367_v21  ;;  %v2371_v17 = vadd.f32 %v2332_v23, %v2137_v31  ;;  %v2127_v2 = vadd.f32 %v4954_v50, %v1893_v43  ;;  %v4955_v21 = vld [vmem:[#allocation22_spill] sm:$0xff]  ;;  %v4956_v41 = vld [vmem:[#allocation24_spill] sm:$0xff] }
 0x17a   : > { %v3697_v3 = vpop.f32.mrf.mxu0  ;;  %v3731_v8 = vpop.f32.mrf.mxu1  ;;  %v1908_v52 = vadd.f32 %v4955_v21, %v1673_v63  ;;  %v2362_v34 = vadd.f32 %v4956_v41, %v2128_v4  ;;  %v4961_v43 = vld [vmem:[#allocation26_spill] sm:$0xff] }
 0x17b   : > { %2641 = vst [vmem:[%s4787_s8 + $0x38] sm:$0xff] %v2625_v51  ;;  %v2624_v33 = vadd.f32 %v4773_v61, %v2601_v54  ;;  %v2604_v36 = vadd.f32 %v3731_v8, %v2370_v48  ;;  %v2374_v5 = vadd.f32 %v3697_v3, %v2140_v16  ;;  %v4957_v48 = vld [vmem:[#allocation18_spill] sm:$0xff]  ;;  %v4958_v54 = vld [vmem:[#allocation23_spill] sm:$0xff]  ;;  %v2361_v58 = vadd.f32 %v4959_v40, %v2127_v2 }
 0x17c   : > { %v2342_v57 = vpop.f32.mrf.mxu0  ;;  %v2556_v59 = vpop.f32.mrf.mxu1  ;;  %v2130_v51 = vadd.f32 %v4957_v48, %v1896_v46  ;;  %v1907_v37 = vadd.f32 %v4958_v54, %v1672_v27  ;;  %v2142_v28 = vadd.f32 %v4758_v38, %v1908_v52 }
 0x17d   : > { %2640 = vst [vmem:[%s4787_s8 + $0x30] sm:$0xff] %v2624_v33  ;;  %v2627_v15 = vadd.f32 %v4773_v61, %v2604_v36  ;;  %v2603_v42 = vadd.f32 %v2556_v59, %v2369_v29  ;;  %v2373_v29 = vadd.f32 %v2342_v57, %v2139_v56  ;;  %v4960_v36 = vld [vmem:[#allocation19_spill] sm:$0xff]  ;;  %v4962_v59 = vld [vmem:[#allocation28_spill] sm:$0xff] }
 0x17e   : > { %v3700_v6 = vpop.f32.mrf.mxu0  ;;  %v3734_v0 = vpop.f32.mrf.mxu1  ;;  %v2129_v45 = vadd.f32 %v4960_v36, %v1895_v49  ;;  %v2364_v62 = vadd.f32 %v4961_v43, %v2130_v51  ;;  %v2141_v10 = vadd.f32 %v4762_v7, %v1907_v37 }
 0x17f   : > { %2643 = vst [vmem:[%s4787_s8 + $0x48] sm:$0xff] %v2627_v15  ;;  %v2626_v32 = vadd.f32 %v4773_v61, %v2603_v42  ;;  %v2606_v20 = vadd.f32 %v3734_v0, %v2372_v19  ;;  %v2376_v38 = vadd.f32 %v3700_v6, %v2142_v28 }
 0x180   : > { %v2352_v13 = vpop.f32.mrf.mxu0  ;;  %v2566_v53 = vpop.f32.mrf.mxu1  ;;  %v2363_v12 = vadd.f32 %v4962_v59, %v2129_v45 }
 0x181   : > { %2642 = vst [vmem:[%s4787_s8 + $0x40] sm:$0xff] %v2626_v32  ;;  %v2629_v23 = vadd.f32 %v4773_v61, %v2606_v20  ;;  %v2605_v25 = vadd.f32 %v2566_v53, %v2371_v17  ;;  %v2375_v42 = vadd.f32 %v2352_v13, %v2141_v10 }
 0x182   : > { %v3719_v26 = vpop.f32.mrf.mxu0  ;;  %v3737_v8 = vpop.f32.mrf.mxu1 }
 0x183   : > { %v2596_v60 = vadd.f32 %v3719_v26, %v2362_v34  ;;  %2645 = vst [vmem:[%s4787_s8 + $0x58] sm:$0xff] %v2629_v23  ;;  %v2628_v24 = vadd.f32 %v4773_v61, %v2605_v25  ;;  %v2608_v3 = vadd.f32 %v3737_v8, %v2374_v5 }
 0x184   : > { %v2516_v33 = vpop.f32.mrf.mxu0  ;;  %v2576_v1 = vpop.f32.mrf.mxu1 }
 0x185   : > { %v2619_v11 = vadd.f32 %v4773_v61, %v2596_v60  ;;  %v2595_v46 = vadd.f32 %v2516_v33, %v2361_v58  ;;  %2644 = vst [vmem:[%s4787_s8 + $0x50] sm:$0xff] %v2628_v24  ;;  %v2631_v57 = vadd.f32 %v4773_v61, %v2608_v3  ;;  %v2607_v39 = vadd.f32 %v2576_v1, %v2373_v29 }
 0x186   : > { %v3722_v30 = vpop.f32.mrf.mxu0  ;;  %v3740_v15 = vpop.f32.mrf.mxu1 }
 0x187   : > { %2635 = vst [vmem:[%s4787_s8 + $0x8] sm:$0xff] %v2619_v11  ;;  %v2618_v31 = vadd.f32 %v4773_v61, %v2595_v46  ;;  %v2598_v19 = vadd.f32 %v3722_v30, %v2364_v62  ;;  %2647 = vst [vmem:[%s4787_s8 + $0x68] sm:$0xff] %v2631_v57  ;;  %v2630_v7 = vadd.f32 %v4773_v61, %v2607_v39 }
 0x188   : > { %v2610_v6 = vadd.f32 %v3740_v15, %v2376_v38  ;;  %v2526_v9 = vpop.f32.mrf.mxu0  ;;  %v2586_v44 = vpop.f32.mrf.mxu1 }
 0x189   : > { %2634 = vst [vmem:[%s4787_s8] sm:$0xff] %v2618_v31  ;;  %v2621_v18 = vadd.f32 %v4773_v61, %v2598_v19  ;;  %v2597_v49 = vadd.f32 %v2526_v9, %v2363_v12  ;;  %2646 = vst [vmem:[%s4787_s8 + $0x60] sm:$0xff] %v2630_v7  ;;  %v2609_v55 = vadd.f32 %v2586_v44, %v2375_v42 }
 0x18a   : > { %v2633_v63 = vadd.f32 %v4773_v61, %v2610_v6 }
 0x18b   : > { %2637 = vst [vmem:[%s4787_s8 + $0x18] sm:$0xff] %v2621_v18  ;;  %v2620_v4 = vadd.f32 %v4773_v61, %v2597_v49  ;;  %v2632_v22 = vadd.f32 %v4773_v61, %v2609_v55 }
 0x18c   : > { %2649 = vst [vmem:[%s4787_s8 + $0x78] sm:$0xff] %v2633_v63 }
 0x18d   : > { %2636 = vst [vmem:[%s4787_s8 + $0x10] sm:$0xff] %v2620_v4  ;;  %2648 = vst [vmem:[%s4787_s8 + $0x70] sm:$0xff] %v2632_v22 }
 0x18e   : > { %3848 = shalt.err (!%p3845_p7)
}
 0x18f   : > { %s3849_s15 = scalar_lea.hbm %s4861_s28, 2048  ;;  %s3853_s8 = scalar_lea.hbm %s4916_s7, 8192 }
 0x190   : > { %p3850_p8 = scmp.ne.s32.totalorder %s4861_s28, %s3849_s15  ;;  %p3854_p11 = scmp.lt.s32.totalorder %s4861_s28, %s4916_s7 }
 0x191   : > { %p3855_p12 = scmp.lt.s32.totalorder %s3853_s8, %s3849_s15 }
 0x192   : > { %p3851_p9 = pnand %p3850_p8, %p3988_p5 }
 0x193   : > { %p3856_p13 = por %p3855_p12, %p3854_p11 }
 0x194   : > { %p3852_p10 = pneg %p3851_p9 }
 0x196   : > { %p3857_p0 = pnand %p3856_p13, %p3852_p10 }
 0x198   : > { %3860 = shalt.err (!%p3857_p0)
}
 0x199   : > { %s3908_s23 = smov 128   ;;  %s3909_s16 = smov 8  }
 0x19a   : > { %3759 = dma.vmem_to_hbm [thread:$0]  (%p3988_p5), %s4863_s21, 2048, %s4861_s28, %s2656_s14, %s3908_s23, %s3908_s23, %s3909_s16  }
 0x19b PF: > { %p3769_p1 = scmp.ge.s32.totalorder %s3899_s27, 2  ;;  %s2701_s17 = sand.u32 1, %s3887_s24  }
 0x19c   : > { %s2702_s22 = scalar_lea.sflag [#allocation3], %s2701_s17 }
 0x19d   : > { %p3763_p2 = pnand %p3769_p1, %p3992_p6 }
 0x19f   : > { %p3764_p3 = pneg %p3763_p2 }
 0x1a1   : > { %3878 = dma.done.wait (%p3764_p3), %s2702_s22, 128  }
 0x1a2   : > { %3880 = vsyncadd (%p3764_p3), %s2702_s22, 4294967168  ;;  %s2711_s29 = scalar_lea.sflag [#allocation5], %s2701_s17 }
 0x1a3   : > { %3882 = dma.done.wait (%p3764_p3), %s2711_s29, 2048  }
 0x1a4   : > { %3884 = vsyncadd (%p3764_p3), %s2711_s29, 4294965248  ;;  %p21_p5 = scmp.ge.s32.totalorder %s3975_s30, 6   ;;  %s4963_s24 = smov %s3891_s25 }
 0x1a5   : > { %s4964_s25 = smov %s3895_s26  ;;  %s4965_s26 = smov %s3986_s10 }
 0x1a6   : > { %s4966_s27 = smov %s3975_s30  ;;  %23 = sbr.rel (!%p21_p5) target bundleno = 5 (0x5), region = 112 }
 0x1ab   :  { %2716 = vsyncpa [#allocation3], 1 }
 0x1ac   :  { %2718 = vsyncpa [#allocation3 + $0x1], 1 }
 0x1ad   :  { %2719 = vsyncpa [#allocation5], 1 }
 0x1ae   :  { %2721 = vsyncpa [#allocation5 + $0x1], 1 }

</bundles_post_ra>
